<compile_context>
chip_gen: v6e
topology: v6e:2x2x1
jax: 0.10.0
libtpu: 0.0.40
codegen_flags: <defaults>
</compile_context>

<pallas_src>
import numpy as np
import jax
import jax.numpy as jnp
from jax import lax
from jax.experimental import pallas as pl
from jax.experimental.pallas import tpu as pltpu

LANE = 128      # vreg lane width
SUBLANE = 8     # vreg sublane count


def cnn_lstm_kernel(xpad_ref, convw_ref, wih_ref, pmat_ref, smalls_ref, out_ref):
    N, CLASSES = out_ref.shape
    H = CLASSES                               # LSTM hidden size (== classes)
    KLEN, CP = convw_ref.shape                # conv taps, lane-padded channels
    WP = xpad_ref.shape[1]                    # padded signal length (W + KLEN - 1)
    W = WP - KLEN + 1                         # conv output length (== input W)
    S = W // 8                                # sequence length after AvgPool(1, 8)
    NP = pmat_ref.shape[0] // S               # batch rows padded to a sublane tile

    # ---- packed small parameters ------------------------------------------
    gamma = smalls_ref[0:1, :]                 # (1, CP)
    beta = smalls_ref[1:2, :]                  # (1, CP)
    blstm = smalls_ref[2:3, :4 * H]            # (1, 4H)  (b_ih + b_hh, gates reordered)
    whh_rows = [smalls_ref[3 + j:4 + j, :4 * H] for j in range(H)]  # each (1, 4H)

    # ---- in-kernel im2col (rows ordered (t, n)), (8, KLEN)-tile chunks -----
    x = xpad_ref[...]                                                  # (N, WP)
    tg = SUBLANE // N if (SUBLANE % N == 0 and W % max(1, SUBLANE // N) == 0) else 1
    patches = jnp.concatenate(
        [jnp.concatenate([x[:, t:t + KLEN] for t in range(g, g + tg)], axis=0)
         for g in range(0, W, tg)],
        axis=0)                                                        # (W*N, KLEN)

    # ---- Conv2d(1, C, (1, KLEN)) as one MXU matmul (bias cancels in norm) --
    conv = jnp.dot(patches, convw_ref[...],
                   preferred_element_type=jnp.float32)                 # (W*N, CP)

    # ---- BatchLayer: one-pass per-channel batch stats, gamma in the scale --
    mu = jnp.mean(conv, axis=0, keepdims=True)
    ms = jnp.mean(conv * conv, axis=0, keepdims=True)
    scale = gamma * lax.rsqrt(ms - mu * mu + 1e-5)
    y = (conv - mu) * scale + beta

    # ---- ELU (alpha = 1) ----------------------------------------------------
    y = jnp.where(y > 0, y, jnp.exp(jnp.minimum(y, 0.0)) - 1.0)

    # ---- AvgPool2d((1, 8)) + squeeze + permute(2,0,1) + batch pad: one matmul
    # P[s*NP + m, (8s+w)*N + m] = 1/8 for real batch rows, zero rows otherwise.
    seq = jnp.dot(pmat_ref[...], y, preferred_element_type=jnp.float32)  # (S*NP, CP)

    # ---- LSTM: pre-project all inputs once, then unroll the recurrence -----
    xproj = jnp.dot(seq, wih_ref[...],
                    preferred_element_type=jnp.float32) + blstm        # (S*NP, 4H)

    h = jnp.zeros((NP, H), jnp.float32)
    c = jnp.zeros((NP, H), jnp.float32)
    for t in range(S):                         # static, tiny trip count -> unrolled
        gates = xproj[t * NP:(t + 1) * NP, :]                          # (NP, 4H)
        for j in range(H):                     # W_hh via VPU broadcast-MACs
            gates = gates + h[:, j:j + 1] * whh_rows[j]
        sg = jax.nn.sigmoid(gates[:, :3 * H])  # gates reordered to [i, f, o, g]
        i = sg[:, 0 * H:1 * H]
        f = sg[:, 1 * H:2 * H]
        o = sg[:, 2 * H:3 * H]
        g = jnp.tanh(gates[:, 3 * H:4 * H])
        c = f * c + i * g
        h = o * jnp.tanh(c)

    # ---- LogSoftmax(dim=1) on h_n (real batch rows only) -------------------
    hN = h[:N, :]
    m = jnp.max(hN, axis=1, keepdims=True)
    z = hN - m
    lse = jnp.log(jnp.sum(jnp.exp(z), axis=1, keepdims=True))
    out_ref[...] = z - lse


@jax.jit
def cnn_lstm_forward(x, params):
    """x: (N, 1, 1, W) float32 (NCHW with C=H=1)."""
    N = x.shape[0]
    W = x.shape[-1]
    conv_w = params["conv_w"]                        # (C, KLEN)
    C, KLEN = conv_w.shape
    H = params["w_hh"].shape[1]                      # hidden size == classes
    CLASSES = H
    CP = ((C + LANE - 1) // LANE) * LANE             # channels lane-padded (32 -> 128)
    S = W // 8
    NP = ((N + SUBLANE - 1) // SUBLANE) * SUBLANE    # batch padded to a sublane tile

    # ReplicationPad2d((31, 32, 0, 0)) on the flattened 1-D signal.
    xf = x.reshape(N, W)
    xpad = jnp.pad(xf, ((0, 0), (31, 32)), mode="edge")                # (N, W + 63)

    # Conv weights, lane-padded channels (conv bias dropped: cancels in norm).
    convw_t = jnp.zeros((KLEN, CP), jnp.float32).at[:, :C].set(conv_w.T)

    # LSTM gate reorder: PyTorch [i, f, g, o] -> [i, f, o, g] (static perm).
    perm = np.concatenate([np.arange(0, H), np.arange(H, 2 * H),
                           np.arange(3 * H, 4 * H), np.arange(2 * H, 3 * H)])
    w_ih_r = params["w_ih"][perm]                    # (4H, C)
    w_hh_r = params["w_hh"][perm]                    # (4H, H)
    b_r = (params["b_ih"] + params["b_hh"])[perm]    # (4H,)
    wih_t = jnp.zeros((CP, 4 * H), jnp.float32).at[:C, :].set(w_ih_r.T)

    # Pack all tiny parameters into one (SUBLANE, CP) operand:
    #   row 0: gamma, row 1: beta, row 2: lstm bias, rows 3..3+H-1: W_hh^T rows.
    smalls = jnp.zeros((SUBLANE, CP), jnp.float32)
    smalls = smalls.at[0, :C].set(params["gamma"])
    smalls = smalls.at[1, :C].set(params["beta"])
    smalls = smalls.at[2, :4 * H].set(b_r)
    smalls = smalls.at[3:3 + H, :4 * H].set(w_hh_r.T)

    # Constant pooling matrix: avg-pool-by-8 + (t,n)->(s,n) reorder + zero
    # padding rows, all as one MXU matmul.  (O(N^2*W) entries -> only for
    # small batch; switch to a segmented reduction when N grows.)
    q = jnp.arange(W * N)
    t_q = q // N
    n_q = q % N
    r = jnp.arange(S * NP)
    s_r = r // NP
    m_r = r % NP
    pmat = jnp.where((n_q[None, :] == m_r[:, None])
                     & ((t_q[None, :] // 8) == s_r[:, None])
                     & (m_r[:, None] < N),
                     1.0 / 8.0, 0.0).astype(jnp.float32)               # (S*NP, W*N)

    # Grid-less single invocation: every tensor is a handful of vregs, so the
    # whole pipeline stays VMEM-resident.  (For large batch, add a row-tiled
    # grid with a 'parallel' axis — mandatory earliest on v7x's 64 MiB VMEM.)
    vmem = pl.BlockSpec(memory_space=pltpu.MemorySpace.VMEM)
    return pl.pallas_call(
        cnn_lstm_kernel,
        out_shape=jax.ShapeDtypeStruct((N, CLASSES), jnp.float32),
        in_specs=[vmem] * 5,
        out_specs=vmem,
    )(xpad, convw_t, wih_t, pmat, smalls)


def reference_forward(x, params):
    """Pure-JAX reference mimicking the PyTorch ops (independent code path)."""
    N, _, _, W = x.shape
    conv_w = params["conv_w"]
    C, KLEN = conv_w.shape
    H = params["w_hh"].shape[1]
    xf = x[:, 0, 0, :]
    xpad = jnp.pad(xf, ((0, 0), (31, 32)), mode="edge")
    windows = jnp.stack([xpad[:, t:t + KLEN] for t in range(W)], axis=1)  # (N, W, KLEN)
    conv = jnp.einsum("nwk,ck->ncw", windows, conv_w) + params["conv_b"].reshape(1, C, 1)
    mu = jnp.mean(conv, axis=(0, 2), keepdims=True)
    a = conv - mu
    var = jnp.mean(a * a, axis=(0, 2), keepdims=True)
    y = a / jnp.sqrt(var + 1e-5)
    y = y * params["gamma"].reshape(1, C, 1) + params["beta"].reshape(1, C, 1)
    y = jnp.where(y > 0, y, jnp.exp(jnp.minimum(y, 0.0)) - 1.0)
    S = W // 8
    pooled = y.reshape(N, C, S, 8).mean(-1)             # (N, C, S)
    seq = jnp.transpose(pooled, (2, 0, 1))              # (S, N, C)
    h = jnp.zeros((N, H), jnp.float32)
    c = jnp.zeros((N, H), jnp.float32)
    for t in range(S):
        gates = seq[t] @ params["w_ih"].T + h @ params["w_hh"].T \
                + params["b_ih"] + params["b_hh"]
        i = jax.nn.sigmoid(gates[:, :H])
        f = jax.nn.sigmoid(gates[:, H:2 * H])
        g = jnp.tanh(gates[:, 2 * H:3 * H])
        o = jax.nn.sigmoid(gates[:, 3 * H:])
        c = f * c + i * g
        h = o * jnp.tanh(c)
    return jax.nn.log_softmax(h, axis=1)


if __name__ == "__main__":
    N, W = 2, 64                       # input (N, 1, 1, W); W divisible by 8
    C, KLEN, CLASSES = 32, 64, 2       # kernel_size, kernel_length, classes
    H = CLASSES

    key = jax.random.PRNGKey(0)
    ks = jax.random.split(key, 9)
    bc = 1.0 / np.sqrt(KLEN)           # Conv2d default init bound (fan_in = 1*1*64)
    bl = 1.0 / np.sqrt(H)              # LSTM default init bound
    params = {
        "conv_w": jax.random.uniform(ks[0], (C, KLEN), jnp.float32, -bc, bc),
        "conv_b": jax.random.uniform(ks[1], (C,), jnp.float32, -bc, bc),
        "gamma":  jax.random.uniform(ks[2], (C,), jnp.float32, -0.1, 0.1),
        "beta":   jax.random.uniform(ks[3], (C,), jnp.float32, -0.1, 0.1),
        "w_ih":   jax.random.uniform(ks[4], (4 * H, C), jnp.float32, -bl, bl),
        "w_hh":   jax.random.uniform(ks[5], (4 * H, H), jnp.float32, -bl, bl),
        "b_ih":   jax.random.uniform(ks[6], (4 * H,), jnp.float32, -bl, bl),
        "b_hh":   jax.random.uniform(ks[7], (4 * H,), jnp.float32, -bl, bl),
    }
    x = jax.random.normal(ks[8], (N, 1, 1, W), jnp.float32)

    out = jax.block_until_ready(cnn_lstm_forward(x, params))
    ref = jax.block_until_ready(reference_forward(x, params))
    np.testing.assert_allclose(np.asarray(out), np.asarray(ref), atol=2e-4, rtol=2e-4)

    print("KERNEL_OK")
</pallas_src>

<mosaic_0001>
module attributes {stable_mosaic.version = 11 : i64} {
  func.func @cnn_lstm_kernel(%arg0: memref<2x127xf32, #tpu.memory_space<vmem>>, %arg1: memref<64x128xf32, #tpu.memory_space<vmem>>, %arg2: memref<128x8xf32, #tpu.memory_space<vmem>>, %arg3: memref<64x128xf32, #tpu.memory_space<vmem>>, %arg4: memref<8x128xf32, #tpu.memory_space<vmem>>, %arg5: memref<2x2xf32, #tpu.memory_space<vmem>>) attributes {dimension_semantics = [], scalar_prefetch = 0 : i64, scratch_operands = 0 : i64, tpu.core_type = #tpu.core_type<tc>} {
    %c0 = arith.constant 0 : index
    %c0_0 = arith.constant 0 : index
    %0 = vector.load %arg4[%c0, %c0_0] : memref<8x128xf32, #tpu.memory_space<vmem>>, vector<1x128xf32>
    %c1 = arith.constant 1 : index
    %c0_1 = arith.constant 0 : index
    %1 = vector.load %arg4[%c1, %c0_1] : memref<8x128xf32, #tpu.memory_space<vmem>>, vector<1x128xf32>
    %c2 = arith.constant 2 : index
    %c0_2 = arith.constant 0 : index
    %2 = vector.load %arg4[%c2, %c0_2] : memref<8x128xf32, #tpu.memory_space<vmem>>, vector<1x8xf32>
    %c3 = arith.constant 3 : index
    %c0_3 = arith.constant 0 : index
    %3 = vector.load %arg4[%c3, %c0_3] : memref<8x128xf32, #tpu.memory_space<vmem>>, vector<1x8xf32>
    %c4 = arith.constant 4 : index
    %c0_4 = arith.constant 0 : index
    %4 = vector.load %arg4[%c4, %c0_4] : memref<8x128xf32, #tpu.memory_space<vmem>>, vector<1x8xf32>
    %c0_5 = arith.constant 0 : index
    %c0_6 = arith.constant 0 : index
    %5 = vector.load %arg0[%c0_5, %c0_6] : memref<2x127xf32, #tpu.memory_space<vmem>>, vector<2x127xf32>
    %6 = vector.extract_strided_slice %5 {offsets = [0, 0], sizes = [2, 64], strides = [1, 1]} : vector<2x127xf32> to vector<2x64xf32>
    %7 = vector.extract_strided_slice %5 {offsets = [0, 1], sizes = [2, 64], strides = [1, 1]} : vector<2x127xf32> to vector<2x64xf32>
    %8 = vector.extract_strided_slice %5 {offsets = [0, 2], sizes = [2, 64], strides = [1, 1]} : vector<2x127xf32> to vector<2x64xf32>
    %9 = vector.extract_strided_slice %5 {offsets = [0, 3], sizes = [2, 64], strides = [1, 1]} : vector<2x127xf32> to vector<2x64xf32>
    %10 = tpu.concatenate %6, %7, %8, %9 in 0 : vector<2x64xf32>, vector<2x64xf32>, vector<2x64xf32>, vector<2x64xf32> -> vector<8x64xf32>
    %11 = vector.extract_strided_slice %5 {offsets = [0, 4], sizes = [2, 64], strides = [1, 1]} : vector<2x127xf32> to vector<2x64xf32>
    %12 = vector.extract_strided_slice %5 {offsets = [0, 5], sizes = [2, 64], strides = [1, 1]} : vector<2x127xf32> to vector<2x64xf32>
    %13 = vector.extract_strided_slice %5 {offsets = [0, 6], sizes = [2, 64], strides = [1, 1]} : vector<2x127xf32> to vector<2x64xf32>
    %14 = vector.extract_strided_slice %5 {offsets = [0, 7], sizes = [2, 64], strides = [1, 1]} : vector<2x127xf32> to vector<2x64xf32>
    %15 = tpu.concatenate %11, %12, %13, %14 in 0 : vector<2x64xf32>, vector<2x64xf32>, vector<2x64xf32>, vector<2x64xf32> -> vector<8x64xf32>
    %16 = vector.extract_strided_slice %5 {offsets = [0, 8], sizes = [2, 64], strides = [1, 1]} : vector<2x127xf32> to vector<2x64xf32>
    %17 = vector.extract_strided_slice %5 {offsets = [0, 9], sizes = [2, 64], strides = [1, 1]} : vector<2x127xf32> to vector<2x64xf32>
    %18 = vector.extract_strided_slice %5 {offsets = [0, 10], sizes = [2, 64], strides = [1, 1]} : vector<2x127xf32> to vector<2x64xf32>
    %19 = vector.extract_strided_slice %5 {offsets = [0, 11], sizes = [2, 64], strides = [1, 1]} : vector<2x127xf32> to vector<2x64xf32>
    %20 = tpu.concatenate %16, %17, %18, %19 in 0 : vector<2x64xf32>, vector<2x64xf32>, vector<2x64xf32>, vector<2x64xf32> -> vector<8x64xf32>
    %21 = vector.extract_strided_slice %5 {offsets = [0, 12], sizes = [2, 64], strides = [1, 1]} : vector<2x127xf32> to vector<2x64xf32>
    %22 = vector.extract_strided_slice %5 {offsets = [0, 13], sizes = [2, 64], strides = [1, 1]} : vector<2x127xf32> to vector<2x64xf32>
    %23 = vector.extract_strided_slice %5 {offsets = [0, 14], sizes = [2, 64], strides = [1, 1]} : vector<2x127xf32> to vector<2x64xf32>
    %24 = vector.extract_strided_slice %5 {offsets = [0, 15], sizes = [2, 64], strides = [1, 1]} : vector<2x127xf32> to vector<2x64xf32>
    %25 = tpu.concatenate %21, %22, %23, %24 in 0 : vector<2x64xf32>, vector<2x64xf32>, vector<2x64xf32>, vector<2x64xf32> -> vector<8x64xf32>
    %26 = vector.extract_strided_slice %5 {offsets = [0, 16], sizes = [2, 64], strides = [1, 1]} : vector<2x127xf32> to vector<2x64xf32>
    %27 = vector.extract_strided_slice %5 {offsets = [0, 17], sizes = [2, 64], strides = [1, 1]} : vector<2x127xf32> to vector<2x64xf32>
    %28 = vector.extract_strided_slice %5 {offsets = [0, 18], sizes = [2, 64], strides = [1, 1]} : vector<2x127xf32> to vector<2x64xf32>
    %29 = vector.extract_strided_slice %5 {offsets = [0, 19], sizes = [2, 64], strides = [1, 1]} : vector<2x127xf32> to vector<2x64xf32>
    %30 = tpu.concatenate %26, %27, %28, %29 in 0 : vector<2x64xf32>, vector<2x64xf32>, vector<2x64xf32>, vector<2x64xf32> -> vector<8x64xf32>
    %31 = vector.extract_strided_slice %5 {offsets = [0, 20], sizes = [2, 64], strides = [1, 1]} : vector<2x127xf32> to vector<2x64xf32>
    %32 = vector.extract_strided_slice %5 {offsets = [0, 21], sizes = [2, 64], strides = [1, 1]} : vector<2x127xf32> to vector<2x64xf32>
    %33 = vector.extract_strided_slice %5 {offsets = [0, 22], sizes = [2, 64], strides = [1, 1]} : vector<2x127xf32> to vector<2x64xf32>
    %34 = vector.extract_strided_slice %5 {offsets = [0, 23], sizes = [2, 64], strides = [1, 1]} : vector<2x127xf32> to vector<2x64xf32>
    %35 = tpu.concatenate %31, %32, %33, %34 in 0 : vector<2x64xf32>, vector<2x64xf32>, vector<2x64xf32>, vector<2x64xf32> -> vector<8x64xf32>
    %36 = vector.extract_strided_slice %5 {offsets = [0, 24], sizes = [2, 64], strides = [1, 1]} : vector<2x127xf32> to vector<2x64xf32>
    %37 = vector.extract_strided_slice %5 {offsets = [0, 25], sizes = [2, 64], strides = [1, 1]} : vector<2x127xf32> to vector<2x64xf32>
    %38 = vector.extract_strided_slice %5 {offsets = [0, 26], sizes = [2, 64], strides = [1, 1]} : vector<2x127xf32> to vector<2x64xf32>
    %39 = vector.extract_strided_slice %5 {offsets = [0, 27], sizes = [2, 64], strides = [1, 1]} : vector<2x127xf32> to vector<2x64xf32>
    %40 = tpu.concatenate %36, %37, %38, %39 in 0 : vector<2x64xf32>, vector<2x64xf32>, vector<2x64xf32>, vector<2x64xf32> -> vector<8x64xf32>
    %41 = vector.extract_strided_slice %5 {offsets = [0, 28], sizes = [2, 64], strides = [1, 1]} : vector<2x127xf32> to vector<2x64xf32>
    %42 = vector.extract_strided_slice %5 {offsets = [0, 29], sizes = [2, 64], strides = [1, 1]} : vector<2x127xf32> to vector<2x64xf32>
    %43 = vector.extract_strided_slice %5 {offsets = [0, 30], sizes = [2, 64], strides = [1, 1]} : vector<2x127xf32> to vector<2x64xf32>
    %44 = vector.extract_strided_slice %5 {offsets = [0, 31], sizes = [2, 64], strides = [1, 1]} : vector<2x127xf32> to vector<2x64xf32>
    %45 = tpu.concatenate %41, %42, %43, %44 in 0 : vector<2x64xf32>, vector<2x64xf32>, vector<2x64xf32>, vector<2x64xf32> -> vector<8x64xf32>
    %46 = vector.extract_strided_slice %5 {offsets = [0, 32], sizes = [2, 64], strides = [1, 1]} : vector<2x127xf32> to vector<2x64xf32>
    %47 = vector.extract_strided_slice %5 {offsets = [0, 33], sizes = [2, 64], strides = [1, 1]} : vector<2x127xf32> to vector<2x64xf32>
    %48 = vector.extract_strided_slice %5 {offsets = [0, 34], sizes = [2, 64], strides = [1, 1]} : vector<2x127xf32> to vector<2x64xf32>
    %49 = vector.extract_strided_slice %5 {offsets = [0, 35], sizes = [2, 64], strides = [1, 1]} : vector<2x127xf32> to vector<2x64xf32>
    %50 = tpu.concatenate %46, %47, %48, %49 in 0 : vector<2x64xf32>, vector<2x64xf32>, vector<2x64xf32>, vector<2x64xf32> -> vector<8x64xf32>
    %51 = vector.extract_strided_slice %5 {offsets = [0, 36], sizes = [2, 64], strides = [1, 1]} : vector<2x127xf32> to vector<2x64xf32>
    %52 = vector.extract_strided_slice %5 {offsets = [0, 37], sizes = [2, 64], strides = [1, 1]} : vector<2x127xf32> to vector<2x64xf32>
    %53 = vector.extract_strided_slice %5 {offsets = [0, 38], sizes = [2, 64], strides = [1, 1]} : vector<2x127xf32> to vector<2x64xf32>
    %54 = vector.extract_strided_slice %5 {offsets = [0, 39], sizes = [2, 64], strides = [1, 1]} : vector<2x127xf32> to vector<2x64xf32>
    %55 = tpu.concatenate %51, %52, %53, %54 in 0 : vector<2x64xf32>, vector<2x64xf32>, vector<2x64xf32>, vector<2x64xf32> -> vector<8x64xf32>
    %56 = vector.extract_strided_slice %5 {offsets = [0, 40], sizes = [2, 64], strides = [1, 1]} : vector<2x127xf32> to vector<2x64xf32>
    %57 = vector.extract_strided_slice %5 {offsets = [0, 41], sizes = [2, 64], strides = [1, 1]} : vector<2x127xf32> to vector<2x64xf32>
    %58 = vector.extract_strided_slice %5 {offsets = [0, 42], sizes = [2, 64], strides = [1, 1]} : vector<2x127xf32> to vector<2x64xf32>
    %59 = vector.extract_strided_slice %5 {offsets = [0, 43], sizes = [2, 64], strides = [1, 1]} : vector<2x127xf32> to vector<2x64xf32>
    %60 = tpu.concatenate %56, %57, %58, %59 in 0 : vector<2x64xf32>, vector<2x64xf32>, vector<2x64xf32>, vector<2x64xf32> -> vector<8x64xf32>
    %61 = vector.extract_strided_slice %5 {offsets = [0, 44], sizes = [2, 64], strides = [1, 1]} : vector<2x127xf32> to vector<2x64xf32>
    %62 = vector.extract_strided_slice %5 {offsets = [0, 45], sizes = [2, 64], strides = [1, 1]} : vector<2x127xf32> to vector<2x64xf32>
    %63 = vector.extract_strided_slice %5 {offsets = [0, 46], sizes = [2, 64], strides = [1, 1]} : vector<2x127xf32> to vector<2x64xf32>
    %64 = vector.extract_strided_slice %5 {offsets = [0, 47], sizes = [2, 64], strides = [1, 1]} : vector<2x127xf32> to vector<2x64xf32>
    %65 = tpu.concatenate %61, %62, %63, %64 in 0 : vector<2x64xf32>, vector<2x64xf32>, vector<2x64xf32>, vector<2x64xf32> -> vector<8x64xf32>
    %66 = vector.extract_strided_slice %5 {offsets = [0, 48], sizes = [2, 64], strides = [1, 1]} : vector<2x127xf32> to vector<2x64xf32>
    %67 = vector.extract_strided_slice %5 {offsets = [0, 49], sizes = [2, 64], strides = [1, 1]} : vector<2x127xf32> to vector<2x64xf32>
    %68 = vector.extract_strided_slice %5 {offsets = [0, 50], sizes = [2, 64], strides = [1, 1]} : vector<2x127xf32> to vector<2x64xf32>
    %69 = vector.extract_strided_slice %5 {offsets = [0, 51], sizes = [2, 64], strides = [1, 1]} : vector<2x127xf32> to vector<2x64xf32>
    %70 = tpu.concatenate %66, %67, %68, %69 in 0 : vector<2x64xf32>, vector<2x64xf32>, vector<2x64xf32>, vector<2x64xf32> -> vector<8x64xf32>
    %71 = vector.extract_strided_slice %5 {offsets = [0, 52], sizes = [2, 64], strides = [1, 1]} : vector<2x127xf32> to vector<2x64xf32>
    %72 = vector.extract_strided_slice %5 {offsets = [0, 53], sizes = [2, 64], strides = [1, 1]} : vector<2x127xf32> to vector<2x64xf32>
    %73 = vector.extract_strided_slice %5 {offsets = [0, 54], sizes = [2, 64], strides = [1, 1]} : vector<2x127xf32> to vector<2x64xf32>
    %74 = vector.extract_strided_slice %5 {offsets = [0, 55], sizes = [2, 64], strides = [1, 1]} : vector<2x127xf32> to vector<2x64xf32>
    %75 = tpu.concatenate %71, %72, %73, %74 in 0 : vector<2x64xf32>, vector<2x64xf32>, vector<2x64xf32>, vector<2x64xf32> -> vector<8x64xf32>
    %76 = vector.extract_strided_slice %5 {offsets = [0, 56], sizes = [2, 64], strides = [1, 1]} : vector<2x127xf32> to vector<2x64xf32>
    %77 = vector.extract_strided_slice %5 {offsets = [0, 57], sizes = [2, 64], strides = [1, 1]} : vector<2x127xf32> to vector<2x64xf32>
    %78 = vector.extract_strided_slice %5 {offsets = [0, 58], sizes = [2, 64], strides = [1, 1]} : vector<2x127xf32> to vector<2x64xf32>
    %79 = vector.extract_strided_slice %5 {offsets = [0, 59], sizes = [2, 64], strides = [1, 1]} : vector<2x127xf32> to vector<2x64xf32>
    %80 = tpu.concatenate %76, %77, %78, %79 in 0 : vector<2x64xf32>, vector<2x64xf32>, vector<2x64xf32>, vector<2x64xf32> -> vector<8x64xf32>
    %81 = vector.extract_strided_slice %5 {offsets = [0, 60], sizes = [2, 64], strides = [1, 1]} : vector<2x127xf32> to vector<2x64xf32>
    %82 = vector.extract_strided_slice %5 {offsets = [0, 61], sizes = [2, 64], strides = [1, 1]} : vector<2x127xf32> to vector<2x64xf32>
    %83 = vector.extract_strided_slice %5 {offsets = [0, 62], sizes = [2, 64], strides = [1, 1]} : vector<2x127xf32> to vector<2x64xf32>
    %84 = vector.extract_strided_slice %5 {offsets = [0, 63], sizes = [2, 64], strides = [1, 1]} : vector<2x127xf32> to vector<2x64xf32>
    %85 = tpu.concatenate %81, %82, %83, %84 in 0 : vector<2x64xf32>, vector<2x64xf32>, vector<2x64xf32>, vector<2x64xf32> -> vector<8x64xf32>
    %86 = tpu.concatenate %10, %15, %20, %25, %30, %35, %40, %45, %50, %55, %60, %65, %70, %75, %80, %85 in 0 : vector<8x64xf32>, vector<8x64xf32>, vector<8x64xf32>, vector<8x64xf32>, vector<8x64xf32>, vector<8x64xf32>, vector<8x64xf32>, vector<8x64xf32>, vector<8x64xf32>, vector<8x64xf32>, vector<8x64xf32>, vector<8x64xf32>, vector<8x64xf32>, vector<8x64xf32>, vector<8x64xf32>, vector<8x64xf32> -> vector<128x64xf32>
    %c0_7 = arith.constant 0 : index
    %c0_8 = arith.constant 0 : index
    %87 = vector.load %arg1[%c0_7, %c0_8] : memref<64x128xf32, #tpu.memory_space<vmem>>, vector<64x128xf32>
    %cst = arith.constant dense<0.000000e+00> : vector<128x128xf32>
    %88 = tpu.matmul %86, %87, %cst {dimension_numbers = #tpu.dot_dimension_numbers<[1], [0], [0], [1], [0, 0, 1, 1], [], []>} : vector<128x64xf32>, vector<64x128xf32>, vector<128x128xf32> -> vector<128x128xf32>
    %cst_9 = arith.constant dense<0.000000e+00> : vector<128xf32>
    %89 = vector.multi_reduction <add>, %88, %cst_9 [0] : vector<128x128xf32> to vector<128xf32>
    %90 = vector.shape_cast %89 : vector<128xf32> to vector<1x128xf32>
    %cst_10 = arith.constant 1.280000e+02 : f32
    %91 = vector.broadcast %cst_10 : f32 to vector<1x128xf32>
    %92 = arith.divf %90, %91 : vector<1x128xf32>
    %93 = arith.mulf %88, %88 : vector<128x128xf32>
    %cst_11 = arith.constant dense<0.000000e+00> : vector<128xf32>
    %94 = vector.multi_reduction <add>, %93, %cst_11 [0] : vector<128x128xf32> to vector<128xf32>
    %95 = vector.shape_cast %94 : vector<128xf32> to vector<1x128xf32>
    %cst_12 = arith.constant 1.280000e+02 : f32
    %96 = vector.broadcast %cst_12 : f32 to vector<1x128xf32>
    %97 = arith.divf %95, %96 : vector<1x128xf32>
    %98 = arith.mulf %92, %92 : vector<1x128xf32>
    %99 = arith.subf %97, %98 : vector<1x128xf32>
    %cst_13 = arith.constant 9.99999974E-6 : f32
    %100 = vector.broadcast %cst_13 : f32 to vector<1x128xf32>
    %101 = arith.addf %99, %100 : vector<1x128xf32>
    %102 = math.rsqrt %101 : vector<1x128xf32>
    %103 = arith.mulf %0, %102 : vector<1x128xf32>
    %104 = vector.broadcast %92 : vector<1x128xf32> to vector<128x128xf32>
    %105 = arith.subf %88, %104 : vector<128x128xf32>
    %106 = vector.broadcast %103 : vector<1x128xf32> to vector<128x128xf32>
    %107 = arith.mulf %105, %106 : vector<128x128xf32>
    %108 = vector.broadcast %1 : vector<1x128xf32> to vector<128x128xf32>
    %109 = arith.addf %107, %108 : vector<128x128xf32>
    %cst_14 = arith.constant 0.000000e+00 : f32
    %110 = vector.broadcast %cst_14 : f32 to vector<128x128xf32>
    %111 = arith.cmpf ogt, %109, %110 : vector<128x128xf32>
    %cst_15 = arith.constant 0.000000e+00 : f32
    %112 = vector.broadcast %cst_15 : f32 to vector<128x128xf32>
    %113 = arith.minimumf %109, %112 : vector<128x128xf32>
    %114 = math.exp %113 : vector<128x128xf32>
    %cst_16 = arith.constant 1.000000e+00 : f32
    %115 = vector.broadcast %cst_16 : f32 to vector<128x128xf32>
    %116 = arith.subf %114, %115 : vector<128x128xf32>
    %117 = arith.select %111, %109, %116 : vector<128x128xi1>, vector<128x128xf32>
    %c0_17 = arith.constant 0 : index
    %c0_18 = arith.constant 0 : index
    %118 = vector.load %arg3[%c0_17, %c0_18] : memref<64x128xf32, #tpu.memory_space<vmem>>, vector<64x128xf32>
    %cst_19 = arith.constant dense<0.000000e+00> : vector<64x128xf32>
    %119 = tpu.matmul %118, %117, %cst_19 {dimension_numbers = #tpu.dot_dimension_numbers<[1], [0], [0], [1], [0, 0, 1, 1], [], []>} : vector<64x128xf32>, vector<128x128xf32>, vector<64x128xf32> -> vector<64x128xf32>
    %c0_20 = arith.constant 0 : index
    %c0_21 = arith.constant 0 : index
    %120 = vector.load %arg2[%c0_20, %c0_21] : memref<128x8xf32, #tpu.memory_space<vmem>>, vector<128x8xf32>
    %cst_22 = arith.constant dense<0.000000e+00> : vector<64x8xf32>
    %121 = tpu.matmul %119, %120, %cst_22 {dimension_numbers = #tpu.dot_dimension_numbers<[1], [0], [0], [1], [0, 0, 1, 1], [], []>} : vector<64x128xf32>, vector<128x8xf32>, vector<64x8xf32> -> vector<64x8xf32>
    %122 = vector.broadcast %2 : vector<1x8xf32> to vector<64x8xf32>
    %123 = arith.addf %121, %122 : vector<64x8xf32>
    %cst_23 = arith.constant 0.000000e+00 : f32
    %124 = vector.broadcast %cst_23 : f32 to vector<8x2xf32>
    %cst_24 = arith.constant 0.000000e+00 : f32
    %125 = vector.broadcast %cst_24 : f32 to vector<8x2xf32>
    %126 = vector.extract_strided_slice %123 {offsets = [0, 0], sizes = [8, 8], strides = [1, 1]} : vector<64x8xf32> to vector<8x8xf32>
    %127 = vector.extract_strided_slice %124 {offsets = [0, 0], sizes = [8, 1], strides = [1, 1]} : vector<8x2xf32> to vector<8x1xf32>
    %128 = vector.broadcast %127 : vector<8x1xf32> to vector<8x8xf32>
    %129 = vector.broadcast %3 : vector<1x8xf32> to vector<8x8xf32>
    %130 = arith.mulf %128, %129 : vector<8x8xf32>
    %131 = arith.addf %126, %130 : vector<8x8xf32>
    %132 = vector.extract_strided_slice %124 {offsets = [0, 1], sizes = [8, 1], strides = [1, 1]} : vector<8x2xf32> to vector<8x1xf32>
    %133 = vector.broadcast %132 : vector<8x1xf32> to vector<8x8xf32>
    %134 = vector.broadcast %4 : vector<1x8xf32> to vector<8x8xf32>
    %135 = arith.mulf %133, %134 : vector<8x8xf32>
    %136 = arith.addf %131, %135 : vector<8x8xf32>
    %137 = vector.extract_strided_slice %136 {offsets = [0, 0], sizes = [8, 6], strides = [1, 1]} : vector<8x8xf32> to vector<8x6xf32>
    %138 = arith.negf %137 : vector<8x6xf32>
    %139 = math.exp %138 : vector<8x6xf32>
    %cst_25 = arith.constant 1.000000e+00 : f32
    %140 = vector.broadcast %cst_25 : f32 to vector<8x6xf32>
    %141 = arith.addf %140, %139 : vector<8x6xf32>
    %142 = arith.divf %140, %141 : vector<8x6xf32>
    %143 = vector.extract_strided_slice %142 {offsets = [0, 0], sizes = [8, 2], strides = [1, 1]} : vector<8x6xf32> to vector<8x2xf32>
    %144 = vector.extract_strided_slice %142 {offsets = [0, 2], sizes = [8, 2], strides = [1, 1]} : vector<8x6xf32> to vector<8x2xf32>
    %145 = vector.extract_strided_slice %142 {offsets = [0, 4], sizes = [8, 2], strides = [1, 1]} : vector<8x6xf32> to vector<8x2xf32>
    %146 = vector.extract_strided_slice %136 {offsets = [0, 6], sizes = [8, 2], strides = [1, 1]} : vector<8x8xf32> to vector<8x2xf32>
    %147 = math.tanh %146 : vector<8x2xf32>
    %148 = arith.mulf %144, %125 : vector<8x2xf32>
    %149 = arith.mulf %143, %147 : vector<8x2xf32>
    %150 = arith.addf %148, %149 : vector<8x2xf32>
    %151 = math.tanh %150 : vector<8x2xf32>
    %152 = arith.mulf %145, %151 : vector<8x2xf32>
    %153 = vector.extract_strided_slice %123 {offsets = [8, 0], sizes = [8, 8], strides = [1, 1]} : vector<64x8xf32> to vector<8x8xf32>
    %154 = vector.extract_strided_slice %152 {offsets = [0, 0], sizes = [8, 1], strides = [1, 1]} : vector<8x2xf32> to vector<8x1xf32>
    %155 = vector.broadcast %154 : vector<8x1xf32> to vector<8x8xf32>
    %156 = vector.broadcast %3 : vector<1x8xf32> to vector<8x8xf32>
    %157 = arith.mulf %155, %156 : vector<8x8xf32>
    %158 = arith.addf %153, %157 : vector<8x8xf32>
    %159 = vector.extract_strided_slice %152 {offsets = [0, 1], sizes = [8, 1], strides = [1, 1]} : vector<8x2xf32> to vector<8x1xf32>
    %160 = vector.broadcast %159 : vector<8x1xf32> to vector<8x8xf32>
    %161 = vector.broadcast %4 : vector<1x8xf32> to vector<8x8xf32>
    %162 = arith.mulf %160, %161 : vector<8x8xf32>
    %163 = arith.addf %158, %162 : vector<8x8xf32>
    %164 = vector.extract_strided_slice %163 {offsets = [0, 0], sizes = [8, 6], strides = [1, 1]} : vector<8x8xf32> to vector<8x6xf32>
    %165 = arith.negf %164 : vector<8x6xf32>
    %166 = math.exp %165 : vector<8x6xf32>
    %cst_26 = arith.constant 1.000000e+00 : f32
    %167 = vector.broadcast %cst_26 : f32 to vector<8x6xf32>
    %168 = arith.addf %167, %166 : vector<8x6xf32>
    %169 = arith.divf %167, %168 : vector<8x6xf32>
    %170 = vector.extract_strided_slice %169 {offsets = [0, 0], sizes = [8, 2], strides = [1, 1]} : vector<8x6xf32> to vector<8x2xf32>
    %171 = vector.extract_strided_slice %169 {offsets = [0, 2], sizes = [8, 2], strides = [1, 1]} : vector<8x6xf32> to vector<8x2xf32>
    %172 = vector.extract_strided_slice %169 {offsets = [0, 4], sizes = [8, 2], strides = [1, 1]} : vector<8x6xf32> to vector<8x2xf32>
    %173 = vector.extract_strided_slice %163 {offsets = [0, 6], sizes = [8, 2], strides = [1, 1]} : vector<8x8xf32> to vector<8x2xf32>
    %174 = math.tanh %173 : vector<8x2xf32>
    %175 = arith.mulf %171, %150 : vector<8x2xf32>
    %176 = arith.mulf %170, %174 : vector<8x2xf32>
    %177 = arith.addf %175, %176 : vector<8x2xf32>
    %178 = math.tanh %177 : vector<8x2xf32>
    %179 = arith.mulf %172, %178 : vector<8x2xf32>
    %180 = vector.extract_strided_slice %123 {offsets = [16, 0], sizes = [8, 8], strides = [1, 1]} : vector<64x8xf32> to vector<8x8xf32>
    %181 = vector.extract_strided_slice %179 {offsets = [0, 0], sizes = [8, 1], strides = [1, 1]} : vector<8x2xf32> to vector<8x1xf32>
    %182 = vector.broadcast %181 : vector<8x1xf32> to vector<8x8xf32>
    %183 = vector.broadcast %3 : vector<1x8xf32> to vector<8x8xf32>
    %184 = arith.mulf %182, %183 : vector<8x8xf32>
    %185 = arith.addf %180, %184 : vector<8x8xf32>
    %186 = vector.extract_strided_slice %179 {offsets = [0, 1], sizes = [8, 1], strides = [1, 1]} : vector<8x2xf32> to vector<8x1xf32>
    %187 = vector.broadcast %186 : vector<8x1xf32> to vector<8x8xf32>
    %188 = vector.broadcast %4 : vector<1x8xf32> to vector<8x8xf32>
    %189 = arith.mulf %187, %188 : vector<8x8xf32>
    %190 = arith.addf %185, %189 : vector<8x8xf32>
    %191 = vector.extract_strided_slice %190 {offsets = [0, 0], sizes = [8, 6], strides = [1, 1]} : vector<8x8xf32> to vector<8x6xf32>
    %192 = arith.negf %191 : vector<8x6xf32>
    %193 = math.exp %192 : vector<8x6xf32>
    %cst_27 = arith.constant 1.000000e+00 : f32
    %194 = vector.broadcast %cst_27 : f32 to vector<8x6xf32>
    %195 = arith.addf %194, %193 : vector<8x6xf32>
    %196 = arith.divf %194, %195 : vector<8x6xf32>
    %197 = vector.extract_strided_slice %196 {offsets = [0, 0], sizes = [8, 2], strides = [1, 1]} : vector<8x6xf32> to vector<8x2xf32>
    %198 = vector.extract_strided_slice %196 {offsets = [0, 2], sizes = [8, 2], strides = [1, 1]} : vector<8x6xf32> to vector<8x2xf32>
    %199 = vector.extract_strided_slice %196 {offsets = [0, 4], sizes = [8, 2], strides = [1, 1]} : vector<8x6xf32> to vector<8x2xf32>
    %200 = vector.extract_strided_slice %190 {offsets = [0, 6], sizes = [8, 2], strides = [1, 1]} : vector<8x8xf32> to vector<8x2xf32>
    %201 = math.tanh %200 : vector<8x2xf32>
    %202 = arith.mulf %198, %177 : vector<8x2xf32>
    %203 = arith.mulf %197, %201 : vector<8x2xf32>
    %204 = arith.addf %202, %203 : vector<8x2xf32>
    %205 = math.tanh %204 : vector<8x2xf32>
    %206 = arith.mulf %199, %205 : vector<8x2xf32>
    %207 = vector.extract_strided_slice %123 {offsets = [24, 0], sizes = [8, 8], strides = [1, 1]} : vector<64x8xf32> to vector<8x8xf32>
    %208 = vector.extract_strided_slice %206 {offsets = [0, 0], sizes = [8, 1], strides = [1, 1]} : vector<8x2xf32> to vector<8x1xf32>
    %209 = vector.broadcast %208 : vector<8x1xf32> to vector<8x8xf32>
    %210 = vector.broadcast %3 : vector<1x8xf32> to vector<8x8xf32>
    %211 = arith.mulf %209, %210 : vector<8x8xf32>
    %212 = arith.addf %207, %211 : vector<8x8xf32>
    %213 = vector.extract_strided_slice %206 {offsets = [0, 1], sizes = [8, 1], strides = [1, 1]} : vector<8x2xf32> to vector<8x1xf32>
    %214 = vector.broadcast %213 : vector<8x1xf32> to vector<8x8xf32>
    %215 = vector.broadcast %4 : vector<1x8xf32> to vector<8x8xf32>
    %216 = arith.mulf %214, %215 : vector<8x8xf32>
    %217 = arith.addf %212, %216 : vector<8x8xf32>
    %218 = vector.extract_strided_slice %217 {offsets = [0, 0], sizes = [8, 6], strides = [1, 1]} : vector<8x8xf32> to vector<8x6xf32>
    %219 = arith.negf %218 : vector<8x6xf32>
    %220 = math.exp %219 : vector<8x6xf32>
    %cst_28 = arith.constant 1.000000e+00 : f32
    %221 = vector.broadcast %cst_28 : f32 to vector<8x6xf32>
    %222 = arith.addf %221, %220 : vector<8x6xf32>
    %223 = arith.divf %221, %222 : vector<8x6xf32>
    %224 = vector.extract_strided_slice %223 {offsets = [0, 0], sizes = [8, 2], strides = [1, 1]} : vector<8x6xf32> to vector<8x2xf32>
    %225 = vector.extract_strided_slice %223 {offsets = [0, 2], sizes = [8, 2], strides = [1, 1]} : vector<8x6xf32> to vector<8x2xf32>
    %226 = vector.extract_strided_slice %223 {offsets = [0, 4], sizes = [8, 2], strides = [1, 1]} : vector<8x6xf32> to vector<8x2xf32>
    %227 = vector.extract_strided_slice %217 {offsets = [0, 6], sizes = [8, 2], strides = [1, 1]} : vector<8x8xf32> to vector<8x2xf32>
    %228 = math.tanh %227 : vector<8x2xf32>
    %229 = arith.mulf %225, %204 : vector<8x2xf32>
    %230 = arith.mulf %224, %228 : vector<8x2xf32>
    %231 = arith.addf %229, %230 : vector<8x2xf32>
    %232 = math.tanh %231 : vector<8x2xf32>
    %233 = arith.mulf %226, %232 : vector<8x2xf32>
    %234 = vector.extract_strided_slice %123 {offsets = [32, 0], sizes = [8, 8], strides = [1, 1]} : vector<64x8xf32> to vector<8x8xf32>
    %235 = vector.extract_strided_slice %233 {offsets = [0, 0], sizes = [8, 1], strides = [1, 1]} : vector<8x2xf32> to vector<8x1xf32>
    %236 = vector.broadcast %235 : vector<8x1xf32> to vector<8x8xf32>
    %237 = vector.broadcast %3 : vector<1x8xf32> to vector<8x8xf32>
    %238 = arith.mulf %236, %237 : vector<8x8xf32>
    %239 = arith.addf %234, %238 : vector<8x8xf32>
    %240 = vector.extract_strided_slice %233 {offsets = [0, 1], sizes = [8, 1], strides = [1, 1]} : vector<8x2xf32> to vector<8x1xf32>
    %241 = vector.broadcast %240 : vector<8x1xf32> to vector<8x8xf32>
    %242 = vector.broadcast %4 : vector<1x8xf32> to vector<8x8xf32>
    %243 = arith.mulf %241, %242 : vector<8x8xf32>
    %244 = arith.addf %239, %243 : vector<8x8xf32>
    %245 = vector.extract_strided_slice %244 {offsets = [0, 0], sizes = [8, 6], strides = [1, 1]} : vector<8x8xf32> to vector<8x6xf32>
    %246 = arith.negf %245 : vector<8x6xf32>
    %247 = math.exp %246 : vector<8x6xf32>
    %cst_29 = arith.constant 1.000000e+00 : f32
    %248 = vector.broadcast %cst_29 : f32 to vector<8x6xf32>
    %249 = arith.addf %248, %247 : vector<8x6xf32>
    %250 = arith.divf %248, %249 : vector<8x6xf32>
    %251 = vector.extract_strided_slice %250 {offsets = [0, 0], sizes = [8, 2], strides = [1, 1]} : vector<8x6xf32> to vector<8x2xf32>
    %252 = vector.extract_strided_slice %250 {offsets = [0, 2], sizes = [8, 2], strides = [1, 1]} : vector<8x6xf32> to vector<8x2xf32>
    %253 = vector.extract_strided_slice %250 {offsets = [0, 4], sizes = [8, 2], strides = [1, 1]} : vector<8x6xf32> to vector<8x2xf32>
    %254 = vector.extract_strided_slice %244 {offsets = [0, 6], sizes = [8, 2], strides = [1, 1]} : vector<8x8xf32> to vector<8x2xf32>
    %255 = math.tanh %254 : vector<8x2xf32>
    %256 = arith.mulf %252, %231 : vector<8x2xf32>
    %257 = arith.mulf %251, %255 : vector<8x2xf32>
    %258 = arith.addf %256, %257 : vector<8x2xf32>
    %259 = math.tanh %258 : vector<8x2xf32>
    %260 = arith.mulf %253, %259 : vector<8x2xf32>
    %261 = vector.extract_strided_slice %123 {offsets = [40, 0], sizes = [8, 8], strides = [1, 1]} : vector<64x8xf32> to vector<8x8xf32>
    %262 = vector.extract_strided_slice %260 {offsets = [0, 0], sizes = [8, 1], strides = [1, 1]} : vector<8x2xf32> to vector<8x1xf32>
    %263 = vector.broadcast %262 : vector<8x1xf32> to vector<8x8xf32>
    %264 = vector.broadcast %3 : vector<1x8xf32> to vector<8x8xf32>
    %265 = arith.mulf %263, %264 : vector<8x8xf32>
    %266 = arith.addf %261, %265 : vector<8x8xf32>
    %267 = vector.extract_strided_slice %260 {offsets = [0, 1], sizes = [8, 1], strides = [1, 1]} : vector<8x2xf32> to vector<8x1xf32>
    %268 = vector.broadcast %267 : vector<8x1xf32> to vector<8x8xf32>
    %269 = vector.broadcast %4 : vector<1x8xf32> to vector<8x8xf32>
    %270 = arith.mulf %268, %269 : vector<8x8xf32>
    %271 = arith.addf %266, %270 : vector<8x8xf32>
    %272 = vector.extract_strided_slice %271 {offsets = [0, 0], sizes = [8, 6], strides = [1, 1]} : vector<8x8xf32> to vector<8x6xf32>
    %273 = arith.negf %272 : vector<8x6xf32>
    %274 = math.exp %273 : vector<8x6xf32>
    %cst_30 = arith.constant 1.000000e+00 : f32
    %275 = vector.broadcast %cst_30 : f32 to vector<8x6xf32>
    %276 = arith.addf %275, %274 : vector<8x6xf32>
    %277 = arith.divf %275, %276 : vector<8x6xf32>
    %278 = vector.extract_strided_slice %277 {offsets = [0, 0], sizes = [8, 2], strides = [1, 1]} : vector<8x6xf32> to vector<8x2xf32>
    %279 = vector.extract_strided_slice %277 {offsets = [0, 2], sizes = [8, 2], strides = [1, 1]} : vector<8x6xf32> to vector<8x2xf32>
    %280 = vector.extract_strided_slice %277 {offsets = [0, 4], sizes = [8, 2], strides = [1, 1]} : vector<8x6xf32> to vector<8x2xf32>
    %281 = vector.extract_strided_slice %271 {offsets = [0, 6], sizes = [8, 2], strides = [1, 1]} : vector<8x8xf32> to vector<8x2xf32>
    %282 = math.tanh %281 : vector<8x2xf32>
    %283 = arith.mulf %279, %258 : vector<8x2xf32>
    %284 = arith.mulf %278, %282 : vector<8x2xf32>
    %285 = arith.addf %283, %284 : vector<8x2xf32>
    %286 = math.tanh %285 : vector<8x2xf32>
    %287 = arith.mulf %280, %286 : vector<8x2xf32>
    %288 = vector.extract_strided_slice %123 {offsets = [48, 0], sizes = [8, 8], strides = [1, 1]} : vector<64x8xf32> to vector<8x8xf32>
    %289 = vector.extract_strided_slice %287 {offsets = [0, 0], sizes = [8, 1], strides = [1, 1]} : vector<8x2xf32> to vector<8x1xf32>
    %290 = vector.broadcast %289 : vector<8x1xf32> to vector<8x8xf32>
    %291 = vector.broadcast %3 : vector<1x8xf32> to vector<8x8xf32>
    %292 = arith.mulf %290, %291 : vector<8x8xf32>
    %293 = arith.addf %288, %292 : vector<8x8xf32>
    %294 = vector.extract_strided_slice %287 {offsets = [0, 1], sizes = [8, 1], strides = [1, 1]} : vector<8x2xf32> to vector<8x1xf32>
    %295 = vector.broadcast %294 : vector<8x1xf32> to vector<8x8xf32>
    %296 = vector.broadcast %4 : vector<1x8xf32> to vector<8x8xf32>
    %297 = arith.mulf %295, %296 : vector<8x8xf32>
    %298 = arith.addf %293, %297 : vector<8x8xf32>
    %299 = vector.extract_strided_slice %298 {offsets = [0, 0], sizes = [8, 6], strides = [1, 1]} : vector<8x8xf32> to vector<8x6xf32>
    %300 = arith.negf %299 : vector<8x6xf32>
    %301 = math.exp %300 : vector<8x6xf32>
    %cst_31 = arith.constant 1.000000e+00 : f32
    %302 = vector.broadcast %cst_31 : f32 to vector<8x6xf32>
    %303 = arith.addf %302, %301 : vector<8x6xf32>
    %304 = arith.divf %302, %303 : vector<8x6xf32>
    %305 = vector.extract_strided_slice %304 {offsets = [0, 0], sizes = [8, 2], strides = [1, 1]} : vector<8x6xf32> to vector<8x2xf32>
    %306 = vector.extract_strided_slice %304 {offsets = [0, 2], sizes = [8, 2], strides = [1, 1]} : vector<8x6xf32> to vector<8x2xf32>
    %307 = vector.extract_strided_slice %304 {offsets = [0, 4], sizes = [8, 2], strides = [1, 1]} : vector<8x6xf32> to vector<8x2xf32>
    %308 = vector.extract_strided_slice %298 {offsets = [0, 6], sizes = [8, 2], strides = [1, 1]} : vector<8x8xf32> to vector<8x2xf32>
    %309 = math.tanh %308 : vector<8x2xf32>
    %310 = arith.mulf %306, %285 : vector<8x2xf32>
    %311 = arith.mulf %305, %309 : vector<8x2xf32>
    %312 = arith.addf %310, %311 : vector<8x2xf32>
    %313 = math.tanh %312 : vector<8x2xf32>
    %314 = arith.mulf %307, %313 : vector<8x2xf32>
    %315 = vector.extract_strided_slice %123 {offsets = [56, 0], sizes = [8, 8], strides = [1, 1]} : vector<64x8xf32> to vector<8x8xf32>
    %316 = vector.extract_strided_slice %314 {offsets = [0, 0], sizes = [8, 1], strides = [1, 1]} : vector<8x2xf32> to vector<8x1xf32>
    %317 = vector.broadcast %316 : vector<8x1xf32> to vector<8x8xf32>
    %318 = vector.broadcast %3 : vector<1x8xf32> to vector<8x8xf32>
    %319 = arith.mulf %317, %318 : vector<8x8xf32>
    %320 = arith.addf %315, %319 : vector<8x8xf32>
    %321 = vector.extract_strided_slice %314 {offsets = [0, 1], sizes = [8, 1], strides = [1, 1]} : vector<8x2xf32> to vector<8x1xf32>
    %322 = vector.broadcast %321 : vector<8x1xf32> to vector<8x8xf32>
    %323 = vector.broadcast %4 : vector<1x8xf32> to vector<8x8xf32>
    %324 = arith.mulf %322, %323 : vector<8x8xf32>
    %325 = arith.addf %320, %324 : vector<8x8xf32>
    %326 = vector.extract_strided_slice %325 {offsets = [0, 0], sizes = [8, 6], strides = [1, 1]} : vector<8x8xf32> to vector<8x6xf32>
    %327 = arith.negf %326 : vector<8x6xf32>
    %328 = math.exp %327 : vector<8x6xf32>
    %cst_32 = arith.constant 1.000000e+00 : f32
    %329 = vector.broadcast %cst_32 : f32 to vector<8x6xf32>
    %330 = arith.addf %329, %328 : vector<8x6xf32>
    %331 = arith.divf %329, %330 : vector<8x6xf32>
    %332 = vector.extract_strided_slice %331 {offsets = [0, 0], sizes = [8, 2], strides = [1, 1]} : vector<8x6xf32> to vector<8x2xf32>
    %333 = vector.extract_strided_slice %331 {offsets = [0, 2], sizes = [8, 2], strides = [1, 1]} : vector<8x6xf32> to vector<8x2xf32>
    %334 = vector.extract_strided_slice %331 {offsets = [0, 4], sizes = [8, 2], strides = [1, 1]} : vector<8x6xf32> to vector<8x2xf32>
    %335 = vector.extract_strided_slice %325 {offsets = [0, 6], sizes = [8, 2], strides = [1, 1]} : vector<8x8xf32> to vector<8x2xf32>
    %336 = math.tanh %335 : vector<8x2xf32>
    %337 = arith.mulf %333, %312 : vector<8x2xf32>
    %338 = arith.mulf %332, %336 : vector<8x2xf32>
    %339 = arith.addf %337, %338 : vector<8x2xf32>
    %340 = math.tanh %339 : vector<8x2xf32>
    %341 = arith.mulf %334, %340 : vector<8x2xf32>
    %342 = vector.extract_strided_slice %341 {offsets = [0, 0], sizes = [2, 2], strides = [1, 1]} : vector<8x2xf32> to vector<2x2xf32>
    %cst_33 = arith.constant dense<0xFF800000> : vector<2xf32>
    %343 = vector.multi_reduction <maximumf>, %342, %cst_33 [1] : vector<2x2xf32> to vector<2xf32>
    %344 = vector.shape_cast %343 : vector<2xf32> to vector<2x1xf32>
    %345 = vector.broadcast %344 : vector<2x1xf32> to vector<2x2xf32>
    %346 = arith.subf %342, %345 : vector<2x2xf32>
    %347 = math.exp %346 : vector<2x2xf32>
    %cst_34 = arith.constant dense<0.000000e+00> : vector<2xf32>
    %348 = vector.multi_reduction <add>, %347, %cst_34 [1] : vector<2x2xf32> to vector<2xf32>
    %349 = vector.shape_cast %348 : vector<2xf32> to vector<2x1xf32>
    %350 = math.log %349 : vector<2x1xf32>
    %351 = vector.broadcast %350 : vector<2x1xf32> to vector<2x2xf32>
    %352 = arith.subf %346, %351 : vector<2x2xf32>
    %c0_35 = arith.constant 0 : index
    %c0_36 = arith.constant 0 : index
    %353 = vector.load %arg5[%c0_35, %c0_36] : memref<2x2xf32, #tpu.memory_space<vmem>>, vector<2x2xf32>
    tpu.vector_store %arg5[%c0_35, %c0_36], %352 {strides = array<i32>} : memref<2x2xf32, #tpu.memory_space<vmem>>, vector<2x2xf32>,
    return
  }
}

</mosaic_0001>

<bundles_post_ra>
// kernel: cnn_lstm_forward.1
= control target key start
LH: loop header
LB: loop body
LE: loop exit
PB: predicated region body
PF: predicated region fallthrough
CT: control target
= control target key end

     0   :  { %s1923_s0 = inlined_call_operand.vmem [shape: f32[2,127], index: 0, kind: input, shape index: {}]   ;;  %s1924_s1 = inlined_call_operand.vmem [shape: f32[64,128], index: 1, kind: input, shape index: {}]   ;;  %s1925_s2 = inlined_call_operand.vmem [shape: f32[128,8], index: 2, kind: input, shape index: {}]   ;;  %s1926_s3 = inlined_call_operand.vmem [shape: f32[64,128], index: 3, kind: input, shape index: {}]   ;;  %s1927_s4 = inlined_call_operand.vmem [shape: f32[8,128], index: 4, kind: input, shape index: {}]   ;;  %s1928_s5 = inlined_call_operand.hbm [shape: f32[2,2], index: 5, kind: output, shape index: {}]  }
   0x1   :  { %v26_v0 = vld [vmem:[%s1923_s0] sm:$0x3] }
   0x2   :  { %v28_v1 = vrot.slane %v26_v0, 6  ;;  %v36_v2 = vrot.slane %v26_v0, 2 }
   0x3   :  { %10 = vsyncpa [#allocation3], 0  ;;  %s1451_s20 = smov 127   ;;  %v32_v3 = vrot.slane %v26_v0, 4  ;;  %s1452_s21 = smov 125   ;;  %v84_v4 = vld [vmem:[%s1924_s1 + $0x38] sm:$0xff] }
   0x4   :  { %29 = vrot.lane.b32.xlu0 %v28_v1, %s1451_s20  ;;  %37 = vrot.lane.b32.xlu1 %v36_v2, %s1452_s21  ;;  %s1453_s22 = smov 126   ;;  %v83_v5 = vld [vmem:[%s1924_s1 + $0x30] sm:$0xff]  ;;  %v82_v6 = vld [vmem:[%s1924_s1 + $0x28] sm:$0xff]  ;;  %vm40_vm0 = vcmask 1041408   ;;  %vm42_vm1 = vcmask 1043456   ;;  %vm44_vm2 = vcmask 1045504  }
   0x5   :  { %1167 = vmatprep.subr.mxu0 %v84_v4  ;;  %v81_v7 = vld [vmem:[%s1924_s1 + $0x20] sm:$0xff]  ;;  %v80_v8 = vld [vmem:[%s1924_s1 + $0x18] sm:$0xff]  ;;  %v79_v9 = vld [vmem:[%s1924_s1 + $0x10] sm:$0xff]  ;;  %vm85_vm3 = vcmask 523264   ;;  %s1454_s13 = smov 120   ;;  %s1455_s14 = smov 124  }
   0x6   :  { %1168 = vmatpush3.msra.mxu0 %v84_v4  ;;  %v78_v10 = vld [vmem:[%s1924_s1 + $0x8] sm:$0xff]  ;;  %v77_v11 = vld [vmem:[%s1924_s1] sm:$0xff]  ;;  %s1456_s1 = smov 112   ;;  %s1457_s15 = smov 116   ;;  %v609_v36 = vld [vmem:[%s1925_s2 + $0x78] sm:$0xff] }
   0x7   :  { %1169 = vmatprep.subr.mxu0 %v83_v5  ;;  %s1458_s16 = smov 104   ;;  %s1459_s17 = smov 108   ;;  %v481_v34 = vld [vmem:[%s1926_s3] sm:$0xff]  ;;  %v608_v37 = vld [vmem:[%s1925_s2 + $0x70] sm:$0xff]  ;;  %v607_v40 = vld [vmem:[%s1925_s2 + $0x68] sm:$0xff] }
   0x8   :  { %33 = vrot.lane.b32.xlu0 %v32_v3, %s1453_s22  ;;  %1170 = vmatpush3.msra.mxu0 %v83_v5  ;;  %s1460_s18 = smov 96   ;;  %s1461_s19 = smov 100   ;;  %v606_v44 = vld [vmem:[%s1925_s2 + $0x60] sm:$0xff]  ;;  %v605_v49 = vld [vmem:[%s1925_s2 + $0x58] sm:$0xff]  ;;  %v604_v54 = vld [vmem:[%s1925_s2 + $0x50] sm:$0xff] }
   0x9   :  { %1171 = vmatprep.subr.mxu0 %v82_v6  ;;  %s1462_s20 = smov 88   ;;  %s1463_s21 = smov 92   ;;  %1239 = vmatprep.mubr.f32.mxu1 %v481_v34  ;;  %v603_v59 = vld [vmem:[%s1925_s2 + $0x48] sm:$0xff]  ;;  %v601_v5 = vld [vmem:[%s1925_s2 + $0x38] sm:$0xff] }
   0xa   :  { %1172 = vmatpush3.msra.mxu0 %v82_v6  ;;  %s1464_s22 = smov 80   ;;  %s1465_s23 = smov 84  }
   0xb   :  { %1173 = vmatprep.subr.mxu0 %v81_v7  ;;  %s1466_s24 = smov 72   ;;  %s1467_s25 = smov 76  }
   0xc   :  { %1174 = vmatpush3.msra.mxu0 %v81_v7  ;;  %s1468_s26 = smov 68  }
   0xd   :  { %1175 = vmatprep.subr.mxu0 %v80_v8 }
   0xe   :  { %1176 = vmatpush3.msra.mxu0 %v80_v8 }
   0xf   :  { %1177 = vmatprep.subr.mxu0 %v79_v9 }
  0x10   :  { %1178 = vmatpush3.msra.mxu0 %v79_v9 }
  0x11   :  { %1179 = vmatprep.subr.mxu0 %v78_v10 }
  0x12   :  { %1180 = vmatpush3.msra.mxu0 %v78_v10  ;;  %v600_v10 = vld [vmem:[%s1925_s2 + $0x30] sm:$0xff] }
  0x13   :  { %1181 = vmatprep.subr.mxu0 %v77_v11 }
  0x14   :  { %1182 = vmatpush3.msra.mxu0 %v77_v11 }
  0x15   :  { %1251 = vmatprep.subr.mxu0 %v609_v36 }
  0x76   :  { %v30_v12 = vpop.permute.xlu0 %29  ;;  %v38_v13 = vpop.permute.xlu1 %37 }
  0x77   :  { %v41_v14 = vsel %vm40_vm0, %v26_v0, %v30_v12  ;;  %v602_v0 = vld [vmem:[%s1925_s2 + $0x40] sm:$0xff] }
  0x7a   :  { %v34_v15 = vpop.permute.xlu0 %33 }
  0x7b   :  { %v43_v16 = vsel %vm42_vm1, %v41_v14, %v34_v15  ;;  %v599_v15 = vld [vmem:[%s1925_s2 + $0x28] sm:$0xff] }
  0x7c   :  { %v45_v17 = vsel %vm44_vm2, %v43_v16, %v38_v13 }
  0x7d   :  { %49 = vrot.lane.b32.xlu0 %v45_v17, %s1454_s13  ;;  %47 = vrot.lane.b32.xlu1 %v45_v17, %s1455_s14 }
  0x7e   :  { %1183 = vmatprep.mubr.msk.f32.mxu0 %vm85_vm3, %v45_v17 }
  0x81   :  { %53 = vrot.lane.b32.xlu0 %v45_v17, %s1456_s1  ;;  %51 = vrot.lane.b32.xlu1 %v45_v17, %s1457_s15 }
  0x85   :  { %57 = vrot.lane.b32.xlu0 %v45_v17, %s1458_s16  ;;  %55 = vrot.lane.b32.xlu1 %v45_v17, %s1459_s17 }
  0x89   :  { %61 = vrot.lane.b32.xlu0 %v45_v17, %s1460_s18  ;;  %59 = vrot.lane.b32.xlu1 %v45_v17, %s1461_s19 }
  0x8d   :  { %65 = vrot.lane.b32.xlu0 %v45_v17, %s1462_s20  ;;  %63 = vrot.lane.b32.xlu1 %v45_v17, %s1463_s21  ;;  %s1469_s20 = smov 122  }
  0x91   :  { %69 = vrot.lane.b32.xlu0 %v45_v17, %s1464_s22  ;;  %67 = vrot.lane.b32.xlu1 %v45_v17, %s1465_s23 }
  0x95   :  { %73 = vrot.lane.b32.xlu0 %v45_v17, %s1466_s24  ;;  %71 = vrot.lane.b32.xlu1 %v45_v17, %s1467_s25 }
  0x99   :  { %75 = vrot.lane.b32.xlu1 %v45_v17, %s1468_s26 }
  0xef   :  { %v50_v18 = vpop.permute.xlu0 %49  ;;  %v48_v19 = vpop.permute.xlu1 %47 }
  0xf0   :  { %1184 = vmatmul.mubr.msk.f32.vlgmr.msra.gmra.mxu0 %vm85_vm3, %v48_v19 }
  0xf1   :  { %1186 = vmatprep.mubr.msk.f32.mxu0 %vm85_vm3, %v50_v18  ;;  %1252 = vmatpush3.msra.mxu0 %v609_v36 }
  0xf2   :  { %1253 = vmatprep.subr.mxu0 %v608_v37 }
  0xf3   :  { %v54_v20 = vpop.permute.xlu0 %53  ;;  %v52_v21 = vpop.permute.xlu1 %51  ;;  %1254 = vmatpush3.msra.mxu0 %v608_v37  ;;  %v595_v37 = vld [vmem:[%s1925_s2 + $0x8] sm:$0xff] }
  0xf4   :  { %1187 = vmatmul.mubr.msk.f32.gmra.mxu0 %vm85_vm3, %v52_v21  ;;  %1255 = vmatprep.subr.mxu0 %v607_v40 }
  0xf5   :  { %1189 = vmatprep.mubr.msk.f32.mxu0 %vm85_vm3, %v54_v20  ;;  %1256 = vmatpush3.msra.mxu0 %v607_v40  ;;  %v598_v20 = vld [vmem:[%s1925_s2 + $0x20] sm:$0xff] }
  0xf6   :  { %1257 = vmatprep.subr.mxu0 %v606_v44 }
  0xf7   :  { %v58_v22 = vpop.permute.xlu0 %57  ;;  %v56_v23 = vpop.permute.xlu1 %55  ;;  %1258 = vmatpush3.msra.mxu0 %v606_v44 }
  0xf8   :  { %1190 = vmatmul.mubr.msk.f32.gmra.mxu0 %vm85_vm3, %v56_v23  ;;  %1259 = vmatprep.subr.mxu0 %v605_v49 }
  0xf9   :  { %1192 = vmatprep.mubr.msk.f32.mxu0 %vm85_vm3, %v58_v22  ;;  %1260 = vmatpush3.msra.mxu0 %v605_v49 }
  0xfa   :  { %1261 = vmatprep.subr.mxu0 %v604_v54 }
  0xfb   :  { %v62_v24 = vpop.permute.xlu0 %61  ;;  %v60_v25 = vpop.permute.xlu1 %59  ;;  %1262 = vmatpush3.msra.mxu0 %v604_v54 }
  0xfc   :  { %1193 = vmatmul.mubr.msk.f32.gmra.mxu0 %vm85_vm3, %v60_v25  ;;  %1263 = vmatprep.subr.mxu0 %v603_v59  ;;  %v597_v25 = vld [vmem:[%s1925_s2 + $0x18] sm:$0xff] }
  0xfd   :  { %1195 = vmatprep.mubr.msk.f32.mxu0 %vm85_vm3, %v62_v24  ;;  %1264 = vmatpush3.msra.mxu0 %v603_v59 }
  0xfe   :  { %1265 = vmatprep.subr.mxu0 %v602_v0 }
  0xff   :  { %v66_v26 = vpop.permute.xlu0 %65  ;;  %v64_v27 = vpop.permute.xlu1 %63  ;;  %1266 = vmatpush3.msra.mxu0 %v602_v0 }
 0x100   :  { %1196 = vmatmul.mubr.msk.f32.gmra.mxu0 %vm85_vm3, %v64_v27  ;;  %1267 = vmatprep.subr.mxu0 %v601_v5 }
 0x101   :  { %1198 = vmatprep.mubr.msk.f32.mxu0 %vm85_vm3, %v66_v26  ;;  %1268 = vmatpush3.msra.mxu0 %v601_v5 }
 0x102   :  { %1269 = vmatprep.subr.mxu0 %v600_v10 }
 0x103   :  { %v70_v28 = vpop.permute.xlu0 %69  ;;  %v68_v29 = vpop.permute.xlu1 %67  ;;  %1270 = vmatpush3.msra.mxu0 %v600_v10  ;;  %v345_v10 = vlaneseq }
 0x104   :  { %1199 = vmatmul.mubr.msk.f32.gmra.mxu0 %vm85_vm3, %v68_v29  ;;  %1271 = vmatprep.subr.mxu0 %v599_v15 }
 0x105   :  { %1201 = vmatprep.mubr.msk.f32.mxu0 %vm85_vm3, %v70_v28  ;;  %1272 = vmatpush3.msra.mxu0 %v599_v15 }
 0x106   :  { %1273 = vmatprep.subr.mxu0 %v598_v20 }
 0x107   :  { %v74_v30 = vpop.permute.xlu0 %73  ;;  %v72_v31 = vpop.permute.xlu1 %71  ;;  %1274 = vmatpush3.msra.mxu0 %v598_v20 }
 0x108   :  { %1202 = vmatmul.mubr.msk.f32.gmra.mxu0 %vm85_vm3, %v72_v31  ;;  %1275 = vmatprep.subr.mxu0 %v597_v25 }
 0x109   :  { %1204 = vmatprep.mubr.msk.f32.mxu0 %vm85_vm3, %v74_v30  ;;  %v596_v30 = vld [vmem:[%s1925_s2 + $0x10] sm:$0xff]  ;;  %1276 = vmatpush3.msra.mxu0 %v597_v25 }
 0x10a   :  { %1277 = vmatprep.subr.mxu0 %v596_v30 }
 0x10b   :  { %v76_v32 = vpop.permute.xlu1 %75  ;;  %1278 = vmatpush3.msra.mxu0 %v596_v30 }
 0x10c   :  { %1205 = vmatmul.mubr.msk.f32.gmra.mxu0 %vm85_vm3, %v76_v32  ;;  %1279 = vmatprep.subr.mxu0 %v595_v37 }
 0x10d   :  { %1280 = vmatpush3.msra.mxu0 %v595_v37 }
 0x1b0   :  { %v1548_v33 = vpop.f32.mrf.mxu0 }
 0x1b1   :  { %v287_v41 = vmul.f32 %v1548_v33, %v1548_v33 }
 0x1b2   :  { %v1553_v35 = vpop.f32.mrf.mxu0 }
 0x1b3   :  { %v286_v38 = vmul.f32 %v1553_v35, %v1553_v35  ;;  %v263_v42 = vadd.f32 %v1548_v33, %v1553_v35 }
 0x1b4   :  { %v1563_v39 = vpop.f32.mrf.mxu0 }
 0x1b5   :  { %v302_v45 = vadd.f32 %v287_v41, %v286_v38  ;;  %v289_v50 = vmul.f32 %v1563_v39, %v1563_v39 }
 0x1b6   :  { %v1572_v43 = vpop.f32.mrf.mxu0 }
 0x1b7   :  { %v264_v46 = vadd.f32 %v263_v42, %v1572_v43  ;;  %v288_v47 = vmul.f32 %v1572_v43, %v1572_v43 }
 0x1b8   :  { %v1580_v48 = vpop.f32.mrf.mxu0 }
 0x1b9   :  { %v303_v51 = vadd.f32 %v302_v45, %v288_v47  ;;  %v265_v52 = vadd.f32 %v1563_v39, %v264_v46  ;;  %v291_v60 = vmul.f32 %v1580_v48, %v1580_v48 }
 0x1ba   :  { %v1588_v53 = vpop.f32.mrf.mxu0 }
 0x1bb   :  { %v266_v55 = vadd.f32 %v265_v52, %v1588_v53  ;;  %v290_v56 = vmul.f32 %v1588_v53, %v1588_v53  ;;  %v304_v57 = vadd.f32 %v303_v51, %v289_v50 }
 0x1bc   :  { %v1596_v58 = vpop.f32.mrf.mxu0 }
 0x1bd   :  { %v305_v61 = vadd.f32 %v304_v57, %v290_v56  ;;  %v267_v62 = vadd.f32 %v1580_v48, %v266_v55  ;;  %v293_v6 = vmul.f32 %v1596_v58, %v1596_v58 }
 0x1be   :  { %v1604_v63 = vpop.f32.mrf.mxu0 }
 0x1bf   :  { %v268_v1 = vadd.f32 %v267_v62, %v1604_v63  ;;  %v292_v2 = vmul.f32 %v1604_v63, %v1604_v63  ;;  %v306_v3 = vadd.f32 %v305_v61, %v291_v60 }
 0x1c0   :  { %v1612_v4 = vpop.f32.mrf.mxu0 }
 0x1c1   :  { %v307_v7 = vadd.f32 %v306_v3, %v292_v2  ;;  %v269_v8 = vadd.f32 %v1596_v58, %v268_v1  ;;  %v295_v16 = vmul.f32 %v1612_v4, %v1612_v4 }
 0x1c2   :  { %v1620_v9 = vpop.f32.mrf.mxu0 }
 0x1c3   :  { %v270_v11 = vadd.f32 %v269_v8, %v1620_v9  ;;  %v294_v12 = vmul.f32 %v1620_v9, %v1620_v9  ;;  %v308_v13 = vadd.f32 %v307_v7, %v293_v6 }
 0x1c4   :  { %v1628_v14 = vpop.f32.mrf.mxu0 }
 0x1c5   :  { %v309_v17 = vadd.f32 %v308_v13, %v294_v12  ;;  %v271_v18 = vadd.f32 %v1612_v4, %v270_v11  ;;  %v297_v26 = vmul.f32 %v1628_v14, %v1628_v14  ;;  %v346_v11 = vshrl.u32 %v345_v10, 7  ;;  %v21_v12 = vld [vmem:[%s1927_s4] sm:$0x1] }
 0x1c6   :  { %v1636_v19 = vpop.f32.mrf.mxu0 }
 0x1c7   :  { %v272_v21 = vadd.f32 %v271_v18, %v1636_v19  ;;  %v296_v22 = vmul.f32 %v1636_v19, %v1636_v19  ;;  %v310_v23 = vadd.f32 %v309_v17, %v295_v16  ;;  %v347_v13 = vsub.s32 0, %v346_v11 }
 0x1c8   :  { %v1644_v24 = vpop.f32.mrf.mxu0 }
 0x1c9   :  { %v311_v27 = vadd.f32 %v310_v23, %v296_v22  ;;  %v273_v28 = vadd.f32 %v1628_v14, %v272_v21  ;;  %v299_v38 = vmul.f32 %v1644_v24, %v1644_v24  ;;  %v1684_v23 = vld [vmem:[%s1927_s4 + $0x1] ss:$0 sm:$0xff] }
 0x1ca   :  { %v1652_v29 = vpop.f32.mrf.mxu0 }
 0x1cb   :  { %v274_v31 = vadd.f32 %v273_v28, %v1652_v29  ;;  %v298_v32 = vmul.f32 %v1652_v29, %v1652_v29  ;;  %v312_v34 = vadd.f32 %v311_v27, %v297_v26 }
 0x1cc   :  { %v1206_v36 = vpop.f32.mrf.mxu0 }
 0x1cd   :  { %v313_v40 = vadd.f32 %v312_v34, %v298_v32  ;;  %v275_v41 = vadd.f32 %v1644_v24, %v274_v31  ;;  %v301_v47 = vmul.f32 %v1206_v36, %v1206_v36 }
 0x1ce   :  { %v254_v42 = vpop.f32.mrf.mxu0 }
 0x1cf   :  { %v276_v44 = vadd.f32 %v275_v41, %v254_v42  ;;  %v300_v45 = vmul.f32 %v254_v42, %v254_v42  ;;  %v314_v46 = vadd.f32 %v313_v40, %v299_v38 }
 0x1d1   :  { %v277_v49 = vadd.f32 %v1206_v36, %v276_v44  ;;  %v315_v50 = vadd.f32 %v314_v46, %v300_v45 }
 0x1d3   :  { %v278_v51 = vrot.slane %v277_v49, 4  ;;  %v316_v52 = vadd.f32 %v315_v50, %v301_v47 }
 0x1d5   :  { %v279_v54 = vadd.f32 %v278_v51, %v277_v49  ;;  %v317_v55 = vrot.slane %v316_v52, 4 }
 0x1d7   :  { %v280_v56 = vrot.slane %v279_v54, 2  ;;  %v318_v57 = vadd.f32 %v317_v55, %v316_v52 }
 0x1d9   :  { %v281_v59 = vadd.f32 %v280_v56, %v279_v54  ;;  %v319_v60 = vrot.slane %v318_v57, 2 }
 0x1db   :  { %v282_v61 = vrot.slane %v281_v59, 1  ;;  %v320_v62 = vadd.f32 %v319_v60, %v318_v57 }
 0x1dd   :  { %v283_v0 = vadd.f32 %v282_v61, %v281_v59  ;;  %v321_v1 = vrot.slane %v320_v62, 1 }
 0x1df   :  { %v1666_v2 = vmul.f32 0.0078125, %v283_v0  ;;  %v322_v3 = vadd.f32 %v321_v1, %v320_v62 }
 0x1e1   :  { %v323_v5 = vmul.f32 0.0078125, %v322_v3  ;;  %v324_v6 = vmul.f32 %v1666_v2, %v1666_v2  ;;  %v343_v17 = vsub.f32 %v254_v42, %v1666_v2  ;;  %v344_v20 = vsub.f32 %v1206_v36, %v1666_v2 }
 0x1e2   :  { %v342_v21 = vsub.f32 %v1644_v24, %v1666_v2  ;;  %v341_v22 = vsub.f32 %v1652_v29, %v1666_v2  ;;  %v340_v25 = vsub.f32 %v1628_v14, %v1666_v2  ;;  %v339_v26 = vsub.f32 %v1636_v19, %v1666_v2 }
 0x1e3   :  { %v325_v7 = vsub.f32 %v323_v5, %v324_v6  ;;  %v338_v27 = vsub.f32 %v1612_v4, %v1666_v2  ;;  %v337_v24 = vsub.f32 %v1620_v9, %v1666_v2  ;;  %v336_v47 = vsub.f32 %v1596_v58, %v1666_v2 }
 0x1e4   :  { %v335_v49 = vsub.f32 %v1604_v63, %v1666_v2  ;;  %v334_v59 = vsub.f32 %v1580_v48, %v1666_v2  ;;  %v333_v63 = vsub.f32 %v1588_v53, %v1666_v2  ;;  %v332_v62 = vsub.f32 %v1563_v39, %v1666_v2 }
 0x1e5   :  { %v326_v8 = vadd.f32 1e-05, %v325_v7  ;;  %v331_v0 = vsub.f32 %v1572_v43, %v1666_v2 }
 0x1e7   :  { %1327 = vrsqrt.f32 %v326_v8 }
 0x1f4   :  { %v1328_v15 = vpop.eup %1327 }
 0x1f5   :  { %v328_v16 = vmul.f32 %v1328_v15, %v21_v12 }
 0x1f7   :  { %v1674_v18 = vrot.slane %v328_v16, %v347_v13 }
 0x1f9   :  { %v363_v28 = vmul.f32 %v1674_v18, %v343_v17  ;;  %v364_v29 = vmul.f32 %v1674_v18, %v344_v20  ;;  %v362_v30 = vmul.f32 %v1674_v18, %v342_v21  ;;  %v361_v31 = vmul.f32 %v1674_v18, %v341_v22 }
 0x1fa   :  { %v360_v32 = vmul.f32 %v1674_v18, %v340_v25  ;;  %v359_v14 = vmul.f32 %v1674_v18, %v339_v26  ;;  %v358_v19 = vmul.f32 %v1674_v18, %v338_v27  ;;  %v357_v34 = vmul.f32 %v1674_v18, %v337_v24 }
 0x1fb   :  { %v1703_v4 = vadd.f32 %v1684_v23, %v364_v29  ;;  %v1706_v9 = vadd.f32 %v1684_v23, %v363_v28  ;;  %v1709_v36 = vadd.f32 %v1684_v23, %v362_v30  ;;  %v1712_v37 = vadd.f32 %v1684_v23, %v361_v31 }
 0x1fc   :  { %v1715_v38 = vadd.f32 %v1684_v23, %v360_v32  ;;  %v1718_v40 = vadd.f32 %v1684_v23, %v359_v14  ;;  %v1723_v44 = vadd.f32 %v1684_v23, %v358_v19  ;;  %v1733_v54 = vadd.f32 %v1684_v23, %v357_v34 }
 0x1fd   :  { %v416_v41 = vmin.f32 %v1703_v4, 0.0  ;;  %v415_v42 = vmin.f32 %v1706_v9, 0.0  ;;  %v414_v45 = vmin.f32 %v1709_v36, 0.0  ;;  %v413_v46 = vmin.f32 %v1712_v37, 0.0 }
 0x1fe   :  { %v412_v52 = vmin.f32 %v1715_v38, 0.0  ;;  %v411_v57 = vmin.f32 %v1718_v40, 0.0  ;;  %v410_v58 = vmin.f32 %v1723_v44, 0.0  ;;  %v409_v1 = vmin.f32 %v1733_v54, 0.0 }
 0x1ff   :  { %v447_v50 = vmul.f32 1.442695, %v416_v41  ;;  %v445_v51 = vmul.f32 1.442695, %v415_v42  ;;  %v443_v55 = vmul.f32 1.442695, %v414_v45  ;;  %v356_v48 = vmul.f32 %v1674_v18, %v336_v47 }
 0x200   :  { %v441_v56 = vmul.f32 1.442695, %v413_v46  ;;  %v439_v60 = vmul.f32 1.442695, %v412_v52  ;;  %v437_v61 = vmul.f32 1.442695, %v411_v57  ;;  %v355_v3 = vmul.f32 %v1674_v18, %v335_v49 }
 0x201   :  { %1329 = vpow2.f32 %v447_v50  ;;  %v435_v5 = vmul.f32 1.442695, %v410_v58  ;;  %v354_v6 = vmul.f32 %v1674_v18, %v334_v59  ;;  %v353_v53 = vmul.f32 %v1674_v18, %v333_v63 }
 0x202   :  { %1331 = vpow2.f32 %v445_v51  ;;  %v1751_v7 = vadd.f32 %v1684_v23, %v356_v48  ;;  %v1754_v39 = vadd.f32 %v1684_v23, %v355_v3  ;;  %v352_v43 = vmul.f32 %v1674_v18, %v332_v62 }
 0x203   :  { %1333 = vpow2.f32 %v443_v55  ;;  %v1758_v8 = vadd.f32 %v1684_v23, %v354_v6  ;;  %v1761_v10 = vadd.f32 %v1684_v23, %v353_v53  ;;  %v433_v11 = vmul.f32 1.442695, %v409_v1 }
 0x204   :  { %1335 = vpow2.f32 %v441_v56  ;;  %v408_v12 = vmin.f32 %v1751_v7, 0.0  ;;  %v351_v13 = vmul.f32 %v1674_v18, %v331_v0  ;;  %v407_v15 = vmin.f32 %v1754_v39, 0.0 }
 0x205   :  { %1337 = vpow2.f32 %v439_v60  ;;  %v406_v16 = vmin.f32 %v1758_v8, 0.0  ;;  %v330_v17 = vsub.f32 %v1548_v33, %v1666_v2  ;;  %v1770_v21 = vadd.f32 %v1684_v23, %v352_v43 }
 0x206   :  { %1339 = vpow2.f32 %v437_v61  ;;  %v431_v20 = vmul.f32 1.442695, %v408_v12  ;;  %v405_v22 = vmin.f32 %v1761_v10, 0.0  ;;  %v429_v26 = vmul.f32 1.442695, %v407_v15 }
 0x207   :  { %1341 = vpow2.f32 %v435_v5  ;;  %v350_v25 = vmul.f32 %v1674_v18, %v330_v17  ;;  %v1775_v27 = vadd.f32 %v1684_v23, %v351_v13  ;;  %v329_v24 = vsub.f32 %v1553_v35, %v1666_v2 }
 0x208   :  { %1343 = vpow2.f32 %v433_v11  ;;  %v427_v28 = vmul.f32 1.442695, %v406_v16  ;;  %v404_v33 = vmin.f32 %v1770_v21, 0.0  ;;  %v425_v32 = vmul.f32 1.442695, %v405_v22 }
 0x209   :  { %1345 = vpow2.f32 %v431_v20  ;;  %v1781_v29 = vadd.f32 %v1684_v23, %v350_v25  ;;  %v349_v30 = vmul.f32 %v1674_v18, %v329_v24  ;;  %v403_v34 = vmin.f32 %v1775_v27, 0.0 }
 0x20a   :  { %1347 = vpow2.f32 %v429_v26  ;;  %vm400_vm4 = vcmp.gt.f32.partialorder %v1703_v4, 0.0  ;;  %v423_v18 = vmul.f32 1.442695, %v404_v33  ;;  %vm399_vm5 = vcmp.gt.f32.partialorder %v1706_v9, 0.0  ;;  %v482_v26 = vld [vmem:[%s1926_s3 + $0x8] sm:$0xff] }
 0x20b   :  { %v1786_v41 = vadd.f32 %v1684_v23, %v349_v30  ;;  %1349 = vpow2.f32 %v427_v28  ;;  %v402_v47 = vmin.f32 %v1781_v29, 0.0  ;;  %v421_v51 = vmul.f32 1.442695, %v403_v34  ;;  %v1831_v33 = vld [vmem:[%s1927_s4 + $0x3] ss:$0 sm:$0xff] }
 0x20c   :  { %1351 = vpow2.f32 %v425_v32  ;;  %vm398_vm6 = vcmp.gt.f32.partialorder %v1709_v36, 0.0  ;;  %vm397_vm7 = vcmp.gt.f32.partialorder %v1712_v37, 0.0  ;;  %vm396_vm8 = vcmp.gt.f32.partialorder %v1715_v38, 0.0  ;;  %v1836_v30 = vld [vmem:[%s1927_s4 + $0x4] ss:$0 sm:$0xff] }
 0x20d   :  { %v401_v52 = vmin.f32 %v1786_v41, 0.0  ;;  %1353 = vpow2.f32 %v423_v18  ;;  %v419_v57 = vmul.f32 1.442695, %v402_v47  ;;  %vm395_vm9 = vcmp.gt.f32.partialorder %v1718_v40, 0.0  ;;  %v1842_v32 = vld [vmem:[%s1927_s4 + $0x2] ss:$0 sm:$0xff] }
 0x20e   :  { %v1330_v31 = vpop.eup %1329  ;;  %1355 = vpow2.f32 %v421_v51  ;;  %vm394_vm10 = vcmp.gt.f32.partialorder %v1723_v44, 0.0  ;;  %vm393_vm11 = vcmp.gt.f32.partialorder %v1733_v54, 0.0  ;;  %vm392_vm12 = vcmp.gt.f32.partialorder %v1751_v7, 0.0  ;;  %s1470_s4 = smov 2  }
 0x20f   :  { %v1332_v14 = vpop.eup %1331  ;;  %v1083_v19 = vadd.f32 -1.0, %v1330_v31  ;;  %v417_v58 = vmul.f32 1.442695, %v401_v52  ;;  %1357 = vpow2.f32 %v419_v57  ;;  %vm391_vm13 = vcmp.gt.f32.partialorder %v1754_v39, 0.0 }
 0x210   :  { %v1334_v35 = vpop.eup %1333  ;;  %v1082_v2 = vadd.f32 -1.0, %v1332_v14  ;;  %vm390_vm14 = vcmp.gt.f32.partialorder %v1758_v8, 0.0  ;;  %vm389_vm15 = vcmp.gt.f32.partialorder %v1761_v10, 0.0  ;;  %vm388_vm0 = vcmp.gt.f32.partialorder %v1770_v21, 0.0 }
 0x211   :  { %v1336_v42 = vpop.eup %1335  ;;  %v480_v45 = vsel %vm400_vm4, %v1703_v4, %v1083_v19  ;;  %v1081_v46 = vadd.f32 -1.0, %v1334_v35  ;;  %1359 = vpow2.f32 %v417_v58  ;;  %vm387_vm1 = vcmp.gt.f32.partialorder %v1775_v27, 0.0 }
 0x212   :  { %v1338_v49 = vpop.eup %1337  ;;  %1207 = vmatprep.subr.mxu1 %v480_v45  ;;  %v479_v23 = vsel %vm399_vm5, %v1706_v9, %v1082_v2  ;;  %v1080_v50 = vadd.f32 -1.0, %v1336_v42  ;;  %vm386_vm2 = vcmp.gt.f32.partialorder %v1781_v29, 0.0  ;;  %vm385_vm3 = vcmp.gt.f32.partialorder %v1786_v41, 0.0 }
 0x213   :  { %1208 = vmatpush3.msra.mxu1 %v480_v45  ;;  %v1340_v55 = vpop.eup %1339  ;;  %v478_v4 = vsel %vm398_vm6, %v1709_v36, %v1081_v46  ;;  %v1079_v56 = vadd.f32 -1.0, %v1338_v49  ;;  %v723_v31 = vmul.f32 0.0, %v1831_v33  ;;  %v729_v34 = vmul.f32 0.0, %v1836_v30 }
 0x214   :  { %1209 = vmatprep.subr.mxu1 %v479_v23  ;;  %v1342_v59 = vpop.eup %1341  ;;  %v477_v9 = vsel %vm397_vm7, %v1712_v37, %v1080_v50  ;;  %v1078_v60 = vadd.f32 -1.0, %v1340_v55  ;;  %v1471_v52 = vmov 5   ;;  %v1472_v55 = vmov 4  }
 0x215   :  { %1210 = vmatpush3.msra.mxu1 %v479_v23  ;;  %v1344_v63 = vpop.eup %1343  ;;  %v476_v36 = vsel %vm396_vm8, %v1715_v38, %v1079_v56  ;;  %v1077_v61 = vadd.f32 -1.0, %v1342_v59  ;;  %1319 = vset.pattern.permute.xlu0 %v1471_v52  ;;  %v483_v59 = vld [vmem:[%s1926_s3 + $0x10] sm:$0xff]  ;;  %vm1014_vm4 = vcmask 42016   ;;  %vm1025_vm5 = vcmask 9216  }
 0x216   :  { %1211 = vmatprep.subr.mxu1 %v478_v4  ;;  %v1346_v62 = vpop.eup %1345  ;;  %v475_v0 = vsel %vm395_vm9, %v1718_v40, %v1078_v60  ;;  %v1076_v37 = vadd.f32 -1.0, %v1344_v63  ;;  %1318 = vset.pattern.permute.xlu1 %v1472_v55 }
 0x217   :  { %1212 = vmatpush3.msra.mxu1 %v478_v4  ;;  %v1348_v1 = vpop.eup %1347  ;;  %v474_v3 = vsel %vm394_vm10, %v1723_v44, %v1077_v61  ;;  %v1075_v38 = vadd.f32 -1.0, %v1346_v62 }
 0x218   :  { %1213 = vmatprep.subr.mxu1 %v477_v9  ;;  %v1350_v48 = vpop.eup %1349  ;;  %v473_v6 = vsel %vm393_vm11, %v1733_v54, %v1076_v37  ;;  %v1074_v53 = vadd.f32 -1.0, %v1348_v1 }
 0x219   :  { %1214 = vmatpush3.msra.mxu1 %v477_v9  ;;  %v1352_v5 = vpop.eup %1351  ;;  %v472_v40 = vsel %vm392_vm12, %v1751_v7, %v1075_v38  ;;  %v1073_v43 = vadd.f32 -1.0, %v1350_v48  ;;  %v484_v9 = vld [vmem:[%s1926_s3 + $0x18] sm:$0xff] }
 0x21a   :  { %1215 = vmatprep.subr.mxu1 %v476_v36  ;;  %v1354_v11 = vpop.eup %1353  ;;  %v471_v44 = vsel %vm391_vm13, %v1754_v39, %v1074_v53  ;;  %v1072_v12 = vadd.f32 -1.0, %v1352_v5 }
 0x21b   :  { %1216 = vmatpush3.msra.mxu1 %v476_v36  ;;  %v1356_v13 = vpop.eup %1355  ;;  %v470_v54 = vsel %vm390_vm14, %v1758_v8, %v1073_v43  ;;  %v1071_v15 = vadd.f32 -1.0, %v1354_v11 }
 0x21c   :  { %1217 = vmatprep.subr.mxu1 %v475_v0  ;;  %v1358_v16 = vpop.eup %1357  ;;  %v469_v7 = vsel %vm389_vm15, %v1761_v10, %v1072_v12  ;;  %v1070_v17 = vadd.f32 -1.0, %v1356_v13 }
 0x21d   :  { %1218 = vmatpush3.msra.mxu1 %v475_v0  ;;  %v468_v39 = vsel %vm388_vm0, %v1770_v21, %v1071_v15  ;;  %v1069_v22 = vadd.f32 -1.0, %v1358_v16 }
 0x21e   :  { %1219 = vmatprep.subr.mxu1 %v474_v3  ;;  %v1360_v20 = vpop.eup %1359  ;;  %v467_v8 = vsel %vm387_vm1, %v1775_v27, %v1070_v17  ;;  %v594_v27 = vld [vmem:[%s1925_s2] sm:$0xff] }
 0x21f   :  { %1220 = vmatpush3.msra.mxu1 %v474_v3  ;;  %v1068_v25 = vadd.f32 -1.0, %v1360_v20  ;;  %v466_v10 = vsel %vm386_vm2, %v1781_v29, %v1069_v22  ;;  %1281 = vmatprep.subr.mxu0 %v594_v27 }
 0x220   :  { %1221 = vmatprep.subr.mxu1 %v473_v6  ;;  %1282 = vmatpush3.msra.mxu0 %v594_v27 }
 0x221   :  { %1222 = vmatpush3.msra.mxu1 %v473_v6  ;;  %v465_v21 = vsel %vm385_vm3, %v1786_v41, %v1068_v25 }
 0x222   :  { %1223 = vmatprep.subr.mxu1 %v472_v40 }
 0x223   :  { %1224 = vmatpush3.msra.mxu1 %v472_v40 }
 0x224   :  { %1225 = vmatprep.subr.mxu1 %v471_v44 }
 0x225   :  { %1226 = vmatpush3.msra.mxu1 %v471_v44 }
 0x226   :  { %1227 = vmatprep.subr.mxu1 %v470_v54 }
 0x227   :  { %1228 = vmatpush3.msra.mxu1 %v470_v54 }
 0x228   :  { %1229 = vmatprep.subr.mxu1 %v469_v7 }
 0x229   :  { %1230 = vmatpush3.msra.mxu1 %v469_v7 }
 0x22a   :  { %1231 = vmatprep.subr.mxu1 %v468_v39 }
 0x22b   :  { %1232 = vmatpush3.msra.mxu1 %v468_v39 }
 0x22c   :  { %1233 = vmatprep.subr.mxu1 %v467_v8 }
 0x22d   :  { %1234 = vmatpush3.msra.mxu1 %v467_v8 }
 0x22e   :  { %1235 = vmatprep.subr.mxu1 %v466_v10 }
 0x22f   :  { %1236 = vmatpush3.msra.mxu1 %v466_v10 }
 0x230   :  { %1237 = vmatprep.subr.mxu1 %v465_v21 }
 0x231   :  { %1238 = vmatpush3.msra.mxu1 %v465_v21 }
 0x232   :  { %1240 = vmatmul.mubr.f32.vlgmr.msra.gmra.mxu1 %v482_v26 }
 0x233   :  { %1242 = vmatprep.mubr.f32.mxu1 %v483_v59 }
 0x236   :  { %1243 = vmatmul.mubr.f32.gmra.mxu1 %v484_v9 }
 0x2f2   :  { %v1241_v24 = vpop.f32.mrf.mxu1 }
 0x2f4   :  { %v555_v28 = vpop.f32.mrf.mxu1 }
 0x2f5   :  { %1283 = vmatprep.mubr.f32.mxu0 %v555_v28 }
 0x2f6   :  { %1284 = vmatmul.mubr.f32.vlgmr.msra.gmra.mxu0 %v1241_v24  ;;  %v1244_v53 = vpop.f32.mrf.mxu1 }
 0x2f8   :  { %v565_v40 = vpop.f32.mrf.mxu1 }
 0x2f9   :  { %1286 = vmatprep.mubr.f32.mxu0 %v565_v40 }
 0x2fa   :  { %1287 = vmatmul.mubr.f32.gmra.mxu0 %v1244_v53 }
 0x3b6   :  { %v1285_v29 = vpop.f32.mrf.mxu0 }
 0x3b7   :  { %v686_v63 = vadd.f32 %v1285_v29, %v1842_v32 }
 0x3b8   :  { %v680_v14 = vpop.f32.mrf.mxu0 }
 0x3b9   :  { %v681_v19 = vadd.f32 %v1842_v32, %v680_v14 }
 0x3ba   :  { %v1288_v15 = vpop.f32.mrf.mxu0 }
 0x3bb   :  { %v724_v41 = vadd.f32 %v723_v31, %v681_v19 }
 0x3bc   :  { %v690_v16 = vpop.f32.mrf.mxu0 }
 0x3bd   :  { %v730_v35 = vadd.f32 %v729_v34, %v724_v41  ;;  %v691_v20 = vadd.f32 %v1842_v32, %v690_v16 }
 0x3bf   :  { %1361 = vtanh.f32 %v730_v35  ;;  %v1087_v42 = vmul.f32 -1.442695, %v730_v35 }
 0x3c1   :  { %1363 = vpow2.f32 %v1087_v42  ;;  %v486_v42 = vld [vmem:[%s1926_s3 + $0x28] sm:$0xff] }
 0x3cc   :  { %v1362_v2 = vpop.eup %1361 }
 0x3cd   :  { %740 = vrot.lane.b32.xlu0 %v1362_v2, %s1469_s20  ;;  %v485_v2 = vld [vmem:[%s1926_s3 + $0x20] sm:$0xff] }
 0x3ce   :  { %v1364_v45 = vpop.eup %1363  ;;  %1245 = vmatprep.mubr.f32.mxu1 %v485_v2 }
 0x3cf   :  { %v734_v46 = vadd.f32 1.0, %v1364_v45  ;;  %1246 = vmatmul.mubr.f32.gmra.mxu1 %v486_v42 }
 0x3d1   :  { %1365 = vrcp.f32 %v734_v46 }
 0x3de   :  { %v1366_v18 = vpop.eup %1365 }
 0x3df   :  { %v738_v23 = vmul.f32 0.0, %v1366_v18 }
 0x43f   :  { %v741_v47 = vpop.permute.xlu0 %740 }
 0x440   :  { %v743_v49 = vmul.f32 %v1366_v18, %v741_v47 }
 0x442   :  { %745 = vrot.lane.b32.xlu1 %v743_v49, %s1470_s4 }
 0x4b4   :  { %v746_v50 = vpop.permute.xlu1 %745 }
 0x4b5   :  { %v748_v51 = vadd.f32 %v746_v50, %v738_v23 }
 0x4b7   :  { %1367 = vtanh.f32 %v748_v51 }
 0x4c4   :  { %v1368_v4 = vpop.eup %1367 }
 0x4c5   :  { %751 = vrot.lane.b32.xlu0 %v1368_v4, %s1470_s4 }
 0x537   :  { %v752_v56 = vpop.permute.xlu0 %751 }
 0x538   :  { %v754_v57 = vmul.f32 %v1366_v18, %v752_v56  ;;  %v696_v18 = vadd.f32 %v1288_v15, %v1842_v32 }
 0x53a   :  { %763 = vperm.xlu0 %1319, %v754_v57   ;;  %757 = vperm.xlu1 %1318, %v754_v57  }
 0x5b5   :  { %v764_v60 = vpop.permute.xlu0 %763  ;;  %v758_v58 = vpop.permute.xlu1 %757 }
 0x5b6   :  { %v760_v36 = vmul.f32 %v1831_v33, %v758_v58  ;;  %v766_v61 = vmul.f32 %v1836_v30, %v764_v60  ;;  %v1247_v58 = vpop.f32.mrf.mxu1 }
 0x5b8   :  { %v761_v62 = vadd.f32 %v760_v36, %v686_v63  ;;  %v575_v63 = vpop.f32.mrf.mxu1 }
 0x5b9   :  { %1289 = vmatprep.mubr.f32.mxu0 %v575_v63 }
 0x5ba   :  { %v767_v0 = vadd.f32 %v766_v61, %v761_v62  ;;  %1290 = vmatmul.mubr.f32.gmra.mxu0 %v1247_v58 }
 0x5bc   :  { %1369 = vtanh.f32 %v767_v0  ;;  %v1088_v1 = vmul.f32 -1.442695, %v767_v0 }
 0x5be   :  { %1371 = vpow2.f32 %v1088_v1 }
 0x5c9   :  { %v1370_v37 = vpop.eup %1369 }
 0x5ca   :  { %777 = vrot.lane.b32.xlu1 %v1370_v37, %s1469_s20 }
 0x5cb   :  { %v1372_v48 = vpop.eup %1371 }
 0x5cc   :  { %v771_v3 = vadd.f32 1.0, %v1372_v48 }
 0x5ce   :  { %1373 = vrcp.f32 %v771_v3 }
 0x5db   :  { %v1374_v38 = vpop.eup %1373 }
 0x5dc   :  { %v775_v43 = vmul.f32 %v1374_v38, %v748_v51 }
 0x63c   :  { %v778_v5 = vpop.permute.xlu1 %777 }
 0x63d   :  { %v780_v6 = vmul.f32 %v1374_v38, %v778_v5 }
 0x63f   :  { %782 = vrot.lane.b32.xlu1 %v780_v6, %s1470_s4 }
 0x67a   :  { %v1291_v48 = vpop.f32.mrf.mxu0 }
 0x67c   :  { %v700_v3 = vpop.f32.mrf.mxu0 }
 0x67d   :  { %v701_v6 = vadd.f32 %v1842_v32, %v700_v3 }
 0x6b1   :  { %v783_v11 = vpop.permute.xlu1 %782 }
 0x6b2   :  { %v785_v44 = vadd.f32 %v783_v11, %v775_v43 }
 0x6b4   :  { %1375 = vtanh.f32 %v785_v44 }
 0x6c1   :  { %v1376_v12 = vpop.eup %1375 }
 0x6c2   :  { %788 = vrot.lane.b32.xlu0 %v1376_v12, %s1470_s4 }
 0x734   :  { %v789_v13 = vpop.permute.xlu0 %788 }
 0x735   :  { %v791_v54 = vmul.f32 %v1374_v38, %v789_v13 }
 0x737   :  { %800 = vperm.xlu0 %1319, %v791_v54   ;;  %794 = vperm.xlu1 %1318, %v791_v54  }
 0x73b   :  { %1320 = vset.pattern.permute.xlu0 %v1472_v55  ;;  %1321 = vset.pattern.permute.xlu1 %v1471_v52 }
 0x7b2   :  { %v801_v7 = vpop.permute.xlu0 %800  ;;  %v795_v17 = vpop.permute.xlu1 %794 }
 0x7b3   :  { %v797_v39 = vmul.f32 %v1831_v33, %v795_v17  ;;  %v803_v22 = vmul.f32 %v1836_v30, %v801_v7 }
 0x7b5   :  { %v798_v8 = vadd.f32 %v797_v39, %v691_v20 }
 0x7b7   :  { %v804_v25 = vadd.f32 %v803_v22, %v798_v8 }
 0x7b9   :  { %1377 = vtanh.f32 %v804_v25  ;;  %v1089_v21 = vmul.f32 -1.442695, %v804_v25 }
 0x7bb   :  { %1379 = vpow2.f32 %v1089_v21  ;;  %v488_v21 = vld [vmem:[%s1926_s3 + $0x38] sm:$0xff] }
 0x7c6   :  { %v1378_v10 = vpop.eup %1377 }
 0x7c7   :  { %814 = vrot.lane.b32.xlu1 %v1378_v10, %s1469_s20  ;;  %v487_v10 = vld [vmem:[%s1926_s3 + $0x30] sm:$0xff]  ;;  %s1473_s3 = smov [#allocation2]  }
 0x7c8   :  { %v1380_v26 = vpop.eup %1379  ;;  %1248 = vmatprep.mubr.f32.mxu1 %v487_v10  ;;  %s1043_s7 = sshll.u32 %s1473_s3, 4  ;;  %s1044_s7 = int_to_ptr.vmem [resolvable:$true] %s1043_s7 }
 0x7c9   :  { %v808_v27 = vadd.f32 1.0, %v1380_v26  ;;  %1249 = vmatmul.mubr.f32.gmra.mxu1 %v488_v21  ;;  %s1429_s8 = scalar_lea.vmem %s1044_s7, 32  ;;  %p1434_p1 = scmp.lt.s32.totalorder %s1044_s7, %s1044_s7 }
 0x7ca   :  { %p1430_p0 = scmp.ne.s32.totalorder %s1044_s7, %s1429_s8  ;;  %p1435_p2 = scmp.lt.s32.totalorder %s1429_s8, %s1429_s8 }
 0x7cb   :  { %1381 = vrcp.f32 %v808_v27 }
 0x7cc   :  { %p1436_p3 = por %p1435_p2, %p1434_p1 }
 0x7ce   :  { %p1437_p4 = pnand %p1436_p3, %p1430_p0 }
 0x7d8   :  { %v1382_v24 = vpop.eup %1381 }
 0x7d9   :  { %v812_v31 = vmul.f32 %v1382_v24, %v785_v44 }
 0x839   :  { %v815_v28 = vpop.permute.xlu1 %814 }
 0x83a   :  { %v817_v29 = vmul.f32 %v1382_v24, %v815_v28 }
 0x83c   :  { %819 = vrot.lane.b32.xlu0 %v817_v29, %s1470_s4 }
 0x8ae   :  { %v820_v14 = vpop.permute.xlu0 %819 }
 0x8af   :  { %v822_v19 = vadd.f32 %v820_v14, %v812_v31 }
 0x8b1   :  { %1383 = vtanh.f32 %v822_v19 }
 0x8be   :  { %v1384_v34 = vpop.eup %1383 }
 0x8bf   :  { %825 = vrot.lane.b32.xlu1 %v1384_v34, %s1470_s4 }
 0x931   :  { %v826_v41 = vpop.permute.xlu1 %825 }
 0x932   :  { %v828_v35 = vmul.f32 %v1382_v24, %v826_v41  ;;  %v706_v24 = vadd.f32 %v1291_v48, %v1842_v32 }
 0x934   :  { %837 = vperm.xlu1 %1321, %v828_v35   ;;  %831 = vperm.xlu0 %1320, %v828_v35  }
 0x9af   :  { %v838_v45 = vpop.permute.xlu1 %837  ;;  %v832_v46 = vpop.permute.xlu0 %831 }
 0x9b0   :  { %v834_v47 = vmul.f32 %v1831_v33, %v832_v46  ;;  %v840_v49 = vmul.f32 %v1836_v30, %v838_v45  ;;  %v1250_v46 = vpop.f32.mrf.mxu1 }
 0x9b2   :  { %v835_v23 = vadd.f32 %v834_v47, %v696_v18  ;;  %v585_v18 = vpop.f32.mrf.mxu1 }
 0x9b3   :  { %1292 = vmatprep.mubr.f32.mxu0 %v585_v18 }
 0x9b4   :  { %v841_v50 = vadd.f32 %v840_v49, %v835_v23  ;;  %1293 = vmatmul.mubr.f32.gmra.mxu0 %v1250_v46 }
 0x9b6   :  { %1385 = vtanh.f32 %v841_v50  ;;  %v1090_v4 = vmul.f32 -1.442695, %v841_v50 }
 0x9b8   :  { %1387 = vpow2.f32 %v1090_v4 }
 0x9c3   :  { %v1386_v51 = vpop.eup %1385 }
 0x9c4   :  { %851 = vrot.lane.b32.xlu1 %v1386_v51, %s1469_s20 }
 0x9c5   :  { %v1388_v56 = vpop.eup %1387 }
 0x9c6   :  { %v845_v57 = vadd.f32 1.0, %v1388_v56 }
 0x9c8   :  { %1389 = vrcp.f32 %v845_v57 }
 0x9d5   :  { %v1390_v59 = vpop.eup %1389 }
 0x9d6   :  { %v849_v36 = vmul.f32 %v1390_v59, %v822_v19 }
 0xa36   :  { %v852_v9 = vpop.permute.xlu1 %851 }
 0xa37   :  { %v854_v60 = vmul.f32 %v1390_v59, %v852_v9 }
 0xa39   :  { %856 = vrot.lane.b32.xlu0 %v854_v60, %s1470_s4 }
 0xa74   :  { %v1294_v56 = vpop.f32.mrf.mxu0 }
 0xa76   :  { %v710_v57 = vpop.f32.mrf.mxu0 }
 0xa77   :  { %v711_v60 = vadd.f32 %v1842_v32, %v710_v57 }
 0xaab   :  { %v857_v61 = vpop.permute.xlu0 %856 }
 0xaac   :  { %v859_v62 = vadd.f32 %v857_v61, %v849_v36 }
 0xaae   :  { %1391 = vtanh.f32 %v859_v62 }
 0xabb   :  { %v1392_v0 = vpop.eup %1391 }
 0xabc   :  { %862 = vrot.lane.b32.xlu1 %v1392_v0, %s1470_s4 }
 0xb2e   :  { %v863_v37 = vpop.permute.xlu1 %862 }
 0xb2f   :  { %v865_v1 = vmul.f32 %v1390_v59, %v863_v37 }
 0xb31   :  { %874 = vperm.xlu1 %1321, %v865_v1   ;;  %868 = vperm.xlu0 %1320, %v865_v1  }
 0xb35   :  { %1322 = vset.pattern.permute.xlu1 %v1472_v55  ;;  %1323 = vset.pattern.permute.xlu0 %v1471_v52 }
 0xbac   :  { %v875_v38 = vpop.permute.xlu1 %874  ;;  %v869_v5 = vpop.permute.xlu0 %868 }
 0xbad   :  { %v871_v53 = vmul.f32 %v1831_v33, %v869_v5  ;;  %v877_v40 = vmul.f32 %v1836_v30, %v875_v38 }
 0xbaf   :  { %v872_v43 = vadd.f32 %v871_v53, %v701_v6 }
 0xbb1   :  { %v878_v11 = vadd.f32 %v877_v40, %v872_v43 }
 0xbb3   :  { %1393 = vtanh.f32 %v878_v11  ;;  %v1091_v12 = vmul.f32 -1.442695, %v878_v11 }
 0xbb5   :  { %1395 = vpow2.f32 %v1091_v12  ;;  %v716_v12 = vadd.f32 %v1294_v56, %v1842_v32 }
 0xbc0   :  { %v1394_v44 = vpop.eup %1393 }
 0xbc1   :  { %888 = vrot.lane.b32.xlu0 %v1394_v44, %s1469_s20 }
 0xbc2   :  { %v1396_v13 = vpop.eup %1395 }
 0xbc3   :  { %v882_v54 = vadd.f32 1.0, %v1396_v13 }
 0xbc5   :  { %1397 = vrcp.f32 %v882_v54 }
 0xbd2   :  { %v1398_v15 = vpop.eup %1397 }
 0xbd3   :  { %v886_v17 = vmul.f32 %v1398_v15, %v859_v62 }
 0xc33   :  { %v889_v16 = vpop.permute.xlu0 %888 }
 0xc34   :  { %v891_v7 = vmul.f32 %v1398_v15, %v889_v16 }
 0xc36   :  { %893 = vrot.lane.b32.xlu1 %v891_v7, %s1470_s4 }
 0xca8   :  { %v894_v20 = vpop.permute.xlu1 %893 }
 0xca9   :  { %v896_v39 = vadd.f32 %v894_v20, %v886_v17 }
 0xcab   :  { %1399 = vtanh.f32 %v896_v39 }
 0xcb8   :  { %v1400_v22 = vpop.eup %1399 }
 0xcb9   :  { %899 = vrot.lane.b32.xlu0 %v1400_v22, %s1470_s4 }
 0xd2b   :  { %v900_v8 = vpop.permute.xlu0 %899 }
 0xd2c   :  { %v902_v25 = vmul.f32 %v1398_v15, %v900_v8 }
 0xd2e   :  { %911 = vperm.xlu0 %1323, %v902_v25   ;;  %905 = vperm.xlu1 %1322, %v902_v25  }
 0xda9   :  { %v912_v26 = vpop.permute.xlu0 %911  ;;  %v906_v27 = vpop.permute.xlu1 %905 }
 0xdaa   :  { %v908_v28 = vmul.f32 %v1831_v33, %v906_v27  ;;  %v914_v29 = vmul.f32 %v1836_v30, %v912_v26 }
 0xdac   :  { %v909_v31 = vadd.f32 %v908_v28, %v706_v24 }
 0xdae   :  { %v915_v14 = vadd.f32 %v914_v29, %v909_v31 }
 0xdb0   :  { %1401 = vtanh.f32 %v915_v14  ;;  %v1092_v34 = vmul.f32 -1.442695, %v915_v14 }
 0xdb2   :  { %1403 = vpow2.f32 %v1092_v34 }
 0xdbd   :  { %v1402_v19 = vpop.eup %1401 }
 0xdbe   :  { %925 = vrot.lane.b32.xlu1 %v1402_v19, %s1469_s20 }
 0xdbf   :  { %v1404_v41 = vpop.eup %1403 }
 0xdc0   :  { %v919_v35 = vadd.f32 1.0, %v1404_v41 }
 0xdc2   :  { %1405 = vrcp.f32 %v919_v35 }
 0xdcf   :  { %v1406_v2 = vpop.eup %1405 }
 0xdd0   :  { %v923_v47 = vmul.f32 %v1406_v2, %v896_v39 }
 0xe30   :  { %v926_v42 = vpop.permute.xlu1 %925 }
 0xe31   :  { %v928_v45 = vmul.f32 %v1406_v2, %v926_v42 }
 0xe33   :  { %930 = vrot.lane.b32.xlu1 %v928_v45, %s1470_s4 }
 0xea5   :  { %v931_v49 = vpop.permute.xlu1 %930 }
 0xea6   :  { %v933_v23 = vadd.f32 %v931_v49, %v923_v47 }
 0xea8   :  { %1407 = vtanh.f32 %v933_v23 }
 0xeb5   :  { %v1408_v50 = vpop.eup %1407 }
 0xeb6   :  { %936 = vrot.lane.b32.xlu0 %v1408_v50, %s1470_s4 }
 0xf28   :  { %v937_v51 = vpop.permute.xlu0 %936 }
 0xf29   :  { %v939_v4 = vmul.f32 %v1406_v2, %v937_v51 }
 0xf2b   :  { %948 = vperm.xlu0 %1323, %v939_v4   ;;  %942 = vperm.xlu1 %1322, %v939_v4  }
 0xf2f   :  { %1324 = vset.pattern.permute.xlu0 %v1472_v55  ;;  %1325 = vset.pattern.permute.xlu1 %v1471_v52 }
 0xfa6   :  { %v949_v59 = vpop.permute.xlu0 %948  ;;  %v943_v9 = vpop.permute.xlu1 %942 }
 0xfa7   :  { %v945_v58 = vmul.f32 %v1831_v33, %v943_v9  ;;  %v951_v63 = vmul.f32 %v1836_v30, %v949_v59 }
 0xfa9   :  { %v946_v36 = vadd.f32 %v945_v58, %v711_v60 }
 0xfab   :  { %v952_v61 = vadd.f32 %v951_v63, %v946_v36 }
 0xfad   :  { %1409 = vtanh.f32 %v952_v61  ;;  %v1093_v0 = vmul.f32 -1.442695, %v952_v61 }
 0xfaf   :  { %1411 = vpow2.f32 %v1093_v0 }
 0xfba   :  { %v1410_v62 = vpop.eup %1409 }
 0xfbb   :  { %962 = vrot.lane.b32.xlu1 %v1410_v62, %s1469_s20 }
 0xfbc   :  { %v1412_v55 = vpop.eup %1411 }
 0xfbd   :  { %v956_v37 = vadd.f32 1.0, %v1412_v55 }
 0xfbf   :  { %1413 = vrcp.f32 %v956_v37 }
 0xfcc   :  { %v1414_v1 = vpop.eup %1413 }
 0xfcd   :  { %v960_v38 = vmul.f32 %v1414_v1, %v933_v23 }
0x102d   :  { %v963_v48 = vpop.permute.xlu1 %962 }
0x102e   :  { %v965_v3 = vmul.f32 %v1414_v1, %v963_v48 }
0x1030   :  { %967 = vrot.lane.b32.xlu0 %v965_v3, %s1470_s4 }
0x10a2   :  { %v968_v5 = vpop.permute.xlu0 %967 }
0x10a3   :  { %v970_v6 = vadd.f32 %v968_v5, %v960_v38 }
0x10a5   :  { %1415 = vtanh.f32 %v970_v6 }
0x10b2   :  { %v1416_v53 = vpop.eup %1415 }
0x10b3   :  { %973 = vrot.lane.b32.xlu1 %v1416_v53, %s1470_s4 }
0x1125   :  { %v974_v40 = vpop.permute.xlu1 %973 }
0x1126   :  { %v976_v43 = vmul.f32 %v1414_v1, %v974_v40 }
0x1128   :  { %985 = vperm.xlu1 %1325, %v976_v43   ;;  %979 = vperm.xlu0 %1324, %v976_v43  }
0x112c   :  { %1326 = vset.pattern.permute.xlu0 %v1471_v52 }
0x11a3   :  { %v986_v11 = vpop.permute.xlu1 %985  ;;  %v980_v44 = vpop.permute.xlu0 %979 }
0x11a4   :  { %v982_v13 = vmul.f32 %v1831_v33, %v980_v44  ;;  %v988_v54 = vmul.f32 %v1836_v30, %v986_v11 }
0x11a6   :  { %v983_v15 = vadd.f32 %v982_v13, %v716_v12 }
0x11a8   :  { %v989_v16 = vadd.f32 %v988_v54, %v983_v15 }
0x11aa   :  { %1417 = vtanh.f32 %v989_v16  ;;  %v1094_v17 = vmul.f32 -1.442695, %v989_v16 }
0x11ac   :  { %1419 = vpow2.f32 %v1094_v17 }
0x11b7   :  { %v1418_v7 = vpop.eup %1417 }
0x11b8   :  { %999 = vrot.lane.b32.xlu1 %v1418_v7, %s1469_s20 }
0x11b9   :  { %v1420_v20 = vpop.eup %1419 }
0x11ba   :  { %v993_v39 = vadd.f32 1.0, %v1420_v20 }
0x11bc   :  { %1421 = vrcp.f32 %v993_v39 }
0x11c9   :  { %v1422_v52 = vpop.eup %1421 }
0x11ca   :  { %v997_v32 = vmul.f32 %v1422_v52, %v970_v6 }
0x122a   :  { %v1000_v22 = vpop.permute.xlu1 %999 }
0x122b   :  { %v1002_v8 = vmul.f32 %v1422_v52, %v1000_v22 }
0x122d   :  { %1004 = vrot.lane.b32.xlu0 %v1002_v8, %s1470_s4 }
0x129f   :  { %v1005_v33 = vpop.permute.xlu0 %1004 }
0x12a0   :  { %v1007_v25 = vadd.f32 %v1005_v33, %v997_v32 }
0x12a2   :  { %1423 = vtanh.f32 %v1007_v25 }
0x12af   :  { %v1424_v30 = vpop.eup %1423 }
0x12b0   :  { %1010 = vrot.lane.b32.xlu1 %v1424_v30, %s1470_s4 }
0x1322   :  { %v1011_v10 = vpop.permute.xlu1 %1010 }
0x1323   :  { %v1013_v21 = vmul.f32 %v1422_v52, %v1011_v10 }
0x1325   :  { %v1015_v26 = vsel %vm1014_vm4, %v1013_v21, -inf }
0x1326   :  { %1016 = vmax.xlane.f32.xlu0 %v1015_v26 }
0x13af   :  { %v1017_v27 = vpop.xlane.xlu0 %1016 }
0x13b0   :  { %v1018_v24 = vsub.f32 %v1013_v21, %v1017_v27 }
0x13b2   :  { %v1019_v28 = vmul.f32 1.442695, %v1018_v24 }
0x13b4   :  { %1425 = vpow2.f32 %v1019_v28 }
0x13c1   :  { %v1426_v29 = vpop.eup %1425 }
0x13c2   :  { %1022 = vrot.lane.b32.xlu1 %v1426_v29, %s1455_s14 }
0x1434   :  { %v1023_v31 = vpop.permute.xlu1 %1022 }
0x1435   :  { %v1026_v14 = vsel %vm1025_vm5, %v1023_v31, 0.0 }
0x1436   :  { %1027 = vadd.xlane.f32.xlu1 %v1026_v14 }
0x14bf   :  { %v1028_v19 = vpop.xlane.xlu1 %1027 }
0x14c0   :  { %1427 = vlog2.f32 %v1028_v19 }
0x14cd   :  { %v1428_v34 = vpop.eup %1427 }
0x14ce   :  { %v1030_v41 = vmul.f32 0.6931472, %v1428_v34 }
0x14d0   :  { %v1031_v35 = vsub.f32 %v1018_v24, %v1030_v41 }
0x14d2   :  { %1033 = vrot.lane.b32.xlu0 %v1031_v35, %s1455_s14 }
0x1544   :  { %v1034_v2 = vpop.permute.xlu0 %1033 }
0x1545   :  { %1036 = vst.msk [vmem:[#allocation2] sm:$0x3] %vm1025_vm5, %v1034_v2 }
0x1546   :  { %1440 = shalt.err (!%p1437_p4)
}
0x1547   :  { %1046 = dma.vmem_to_hbm [thread:$0]  %s1044_s7, 32, %s1928_s5, [#allocation3]  }
0x1548   :  { %1449 = dma.done.wait [#allocation3], 32  }
0x1549   :  { %1450 = vsyncadd [#allocation3], 4294967264 }
0x154a   :  { %1050 = vsyncpa [#allocation3], 1 }

</bundles_post_ra>
